<compile_context>
chip_gen: v6e
topology: v6e:2x2x1
jax: 0.10.0
libtpu: 0.0.40
codegen_flags: <defaults>
</compile_context>

<pallas_src>
import jax
import jax.numpy as jnp
from jax.experimental import pallas as pl
from jax.experimental.pallas import tpu as pltpu


# ----------------------------------------------------------------------------
# Small helpers
# ----------------------------------------------------------------------------

def _round_up(n, m):
    return ((n + m - 1) // m) * m


def _weight_spec(shape, single_buffer):
    """BlockSpec covering a whole grid-invariant weight/bias array."""
    idx = lambda i: (0,) * len(shape)
    if single_buffer:
        # Weights never change across grid steps -> single VMEM buffer.
        return pl.BlockSpec(shape, idx, pipeline_mode=pl.Buffered(1))
    return pl.BlockSpec(shape, idx)


def _vmem_limit(tile_bytes, weight_bytes):
    """Size the scoped VMEM limit from the actual buffers (+50% headroom)."""
    est = 2 * tile_bytes + 2 * weight_bytes      # worst case: everything 2x buffered
    est = int(est * 1.5) + (2 << 20)
    return max(16 << 20, min(est, 64 << 20))     # 64 MiB is safe on v5e/v6e/v7x


# ----------------------------------------------------------------------------
# Kernels
# ----------------------------------------------------------------------------

def _qkv_kernel(x_ref, w_ref, b_ref, out_ref):
    """out = x @ W_folded + b.  x tile cast to bf16 in VMEM; f32 accumulation;
    bf16 lane-dense store."""
    x = x_ref[...].astype(jnp.bfloat16)
    acc = jnp.dot(x, w_ref[...], preferred_element_type=jnp.float32) + b_ref[...]
    out_ref[...] = acc.astype(out_ref.dtype)


def _mlp_fuse_kernel(
        feat_ref, h0_ref, h1_ref,
        sw1, sb1, aw1, ab1, bw1, bb1,     # per-head layer-1 (different in_dims)
        w2, b2, w3, b3,                   # block-diagonal layers 2-3 (3h, 3h)
        fw, fb,                           # stacked linear_fuse weight (3h, h)
        out_ref):
    """Three 3-layer ReLU MLP heads + 1x1-conv fuse on one pixel tile.
    Output slab layout (lane-dense): [src | s0 | s1 | fused]."""
    f = feat_ref[...].astype(jnp.bfloat16)
    x0 = h0_ref[...].astype(jnp.bfloat16)
    x1 = h1_ref[...].astype(jnp.bfloat16)

    # Layer 1 (distinct input widths -> three dots), f32 bias/ReLU.
    h_src = jnp.dot(f, sw1[...], preferred_element_type=jnp.float32) + sb1[...]
    h_s0 = jnp.dot(x0, aw1[...], preferred_element_type=jnp.float32) + ab1[...]
    h_s1 = jnp.dot(x1, bw1[...], preferred_element_type=jnp.float32) + bb1[...]
    h = jnp.concatenate([h_src, h_s0, h_s1], axis=-1)          # (tile_n, 3h)
    h = jnp.maximum(h, 0.0).astype(jnp.bfloat16)

    # Layers 2-3: one block-diagonal (3h, 3h) matmul each.
    h = jnp.dot(h, w2[...], preferred_element_type=jnp.float32) + b2[...]
    h = jnp.maximum(h, 0.0).astype(jnp.bfloat16)
    heads = jnp.dot(h, w3[...], preferred_element_type=jnp.float32) + b3[...]

    # linear_fuse(concat([src, s0, s1], C)) == heads @ stacked_fuse_w + fb
    fused = (jnp.dot(heads.astype(jnp.bfloat16), fw[...],
                     preferred_element_type=jnp.float32) + fb[...])

    out_ref[...] = jnp.concatenate([heads, fused], axis=-1).astype(out_ref.dtype)


# ----------------------------------------------------------------------------
# One-time parameter preparation (hoisted out of the per-forward path)
# ----------------------------------------------------------------------------

def prepare_qkv_params(lora_params):
    """Fold the four rank-r adapters into the qkv weight's q/v column slices
    (f32), pad the output lanes to a multiple of 128, cast to bf16."""
    dim = lora_params["w_qkv"].shape[1]
    w = lora_params["w_qkv"].T.astype(jnp.float32)              # (dim, 3*dim)

    def delta(a, b):   # a: (r, dim), b: (dim, r)  ->  (dim, dim)
        return a.T.astype(jnp.float32) @ b.T.astype(jnp.float32)

    w = w.at[:, :dim].add(delta(lora_params["a_q"], lora_params["b_q"])
                          + delta(lora_params["a_q2"], lora_params["b_q2"]))
    w = w.at[:, 2 * dim:].add(delta(lora_params["a_v"], lora_params["b_v"])
                              + delta(lora_params["a_v2"], lora_params["b_v2"]))
    b = lora_params["b_qkv"].astype(jnp.float32)

    out_cols = 3 * dim
    cols_p = _round_up(out_cols, 128)            # lane-dense output stores
    if cols_p != out_cols:
        w = jnp.pad(w, ((0, 0), (0, cols_p - out_cols)))
        b = jnp.pad(b, (0, cols_p - out_cols))
    return {"w": w.astype(jnp.bfloat16),
            "b": b.reshape(1, cols_p),           # f32 bias row
            "dim": dim, "out_cols": out_cols}


def prepare_mlp_params(params):
    """Transpose nn.Linear weights, block-diagonalize layers 2-3 of the three
    heads, stack the 1x1-conv fuse weight, cast to bf16 (biases stay f32)."""
    heads = [params["mlp_src"], params["mlp_feat_s0"], params["mlp_feat_s1"]]
    out_dim = params["mlp_src"]["w3"].shape[0]                  # td // 8

    def layer1(p):
        return (p["w1"].T.astype(jnp.bfloat16),
                p["b1"].reshape(1, -1).astype(jnp.float32))

    sw1, sb1 = layer1(heads[0])
    aw1, ab1 = layer1(heads[1])
    bw1, bb1 = layer1(heads[2])

    def block_diag(mats):
        h = mats[0].shape[0]
        bd = jnp.zeros((len(mats) * h, len(mats) * h), jnp.float32)
        for i, m in enumerate(mats):
            bd = bd.at[i * h:(i + 1) * h, i * h:(i + 1) * h].set(m)
        return bd

    w2 = block_diag([p["w2"].T.astype(jnp.float32) for p in heads]).astype(jnp.bfloat16)
    b2 = jnp.concatenate([p["b2"] for p in heads]).reshape(1, -1).astype(jnp.float32)
    w3 = block_diag([p["w3"].T.astype(jnp.float32) for p in heads]).astype(jnp.bfloat16)
    b3 = jnp.concatenate([p["b3"] for p in heads]).reshape(1, -1).astype(jnp.float32)

    # 1x1 conv (Cout, 3*Cout, 1, 1) -> stacked (3*Cout, Cout) matmul weight.
    fw = params["fuse_w"].reshape(out_dim, 3 * out_dim).T.astype(jnp.bfloat16)
    fb = params["fuse_b"].reshape(1, out_dim).astype(jnp.float32)

    slab = 4 * out_dim                           # [src | s0 | s1 | fused]
    slab_p = _round_up(slab, 128)
    if slab_p != slab:                           # pad fused lanes (one-time)
        pad = slab_p - slab
        fw = jnp.pad(fw, ((0, 0), (0, pad)))
        fb = jnp.pad(fb, ((0, 0), (0, pad)))

    weights = [sw1, sb1, aw1, ab1, bw1, bb1, w2, b2, w3, b3, fw, fb]
    return {"weights": weights, "out_dim": out_dim, "slab": slab, "slab_p": slab_p}


# ----------------------------------------------------------------------------
# Wrappers (layout glue only: reshape, cdiv grid, pallas_call)
# ----------------------------------------------------------------------------

def lora_qkv(x, qkv_prep, *, tile_n=1024):
    """_LoRA_qkv.forward.  x: (B, H, W, dim) -> (B, H, W, 3*dim) (bf16).
    Mathematically identical to qkv(x) with the adapter outputs added into the
    q- and v- column slices (fold done once in prepare_qkv_params)."""
    B, H, W, dim = x.shape
    N = B * H * W
    w, b = qkv_prep["w"], qkv_prep["b"]
    out_cols, cols_p = qkv_prep["out_cols"], w.shape[1]

    xf = x.reshape(N, dim)
    tile_n = max(8, min(tile_n, _round_up(N, 8)))
    grid = (pl.cdiv(N, tile_n),)

    tile_bytes = tile_n * dim * xf.dtype.itemsize + tile_n * cols_p * 2
    weight_bytes = w.size * w.dtype.itemsize + b.size * b.dtype.itemsize
    vmem = _vmem_limit(tile_bytes, weight_bytes)

    def run(single_buffer):
        return pl.pallas_call(
            _qkv_kernel,
            out_shape=jax.ShapeDtypeStruct((N, cols_p), jnp.bfloat16),
            grid=grid,
            in_specs=[pl.BlockSpec((tile_n, dim), lambda i: (i, 0)),
                      _weight_spec(w.shape, single_buffer),
                      _weight_spec(b.shape, single_buffer)],
            out_specs=pl.BlockSpec((tile_n, cols_p), lambda i: (i, 0)),
            compiler_params=pltpu.CompilerParams(
                dimension_semantics=("parallel",),
                vmem_limit_bytes=vmem),
        )(xf, w, b)

    try:
        out = run(True)              # single-buffered grid-invariant weights
    except Exception:
        out = run(False)             # fallback: default double-buffering

    if cols_p != out_cols:
        out = out[:, :out_cols]
    return out.reshape(B, H, W, out_cols)


def mlp_heads_fused(feat_nhwc, hres0_nhwc, hres1_nhwc, mlp_prep, *, tile_n=256):
    """mlp_src / mlp_feat_s0 / mlp_feat_s1 + linear_fuse in one kernel (NHWC).
    Returns (slab, out_dim) where slab is (B, H, W, 4*out_dim) bf16 laid out
    [src | s0 | s1 | fused]; slice lazily via split_mlp_slab as needed."""
    B, H, W, Cs = feat_nhwc.shape
    C0 = hres0_nhwc.shape[-1]
    C1 = hres1_nhwc.shape[-1]
    N = B * H * W
    weights = mlp_prep["weights"]
    out_dim, slab, slab_p = mlp_prep["out_dim"], mlp_prep["slab"], mlp_prep["slab_p"]

    xs = feat_nhwc.reshape(N, Cs)
    x0 = hres0_nhwc.reshape(N, C0)
    x1 = hres1_nhwc.reshape(N, C1)

    tile_n = max(8, min(tile_n, _round_up(N, 8)))
    grid = (pl.cdiv(N, tile_n),)

    in_b = xs.dtype.itemsize
    tile_bytes = tile_n * (Cs + C0 + C1) * in_b + tile_n * slab_p * 2
    weight_bytes = sum(w.size * w.dtype.itemsize for w in weights)
    vmem = _vmem_limit(tile_bytes, weight_bytes)

    def run(single_buffer):
        return pl.pallas_call(
            _mlp_fuse_kernel,
            out_shape=jax.ShapeDtypeStruct((N, slab_p), jnp.bfloat16),
            grid=grid,
            in_specs=[pl.BlockSpec((tile_n, Cs), lambda i: (i, 0)),
                      pl.BlockSpec((tile_n, C0), lambda i: (i, 0)),
                      pl.BlockSpec((tile_n, C1), lambda i: (i, 0))]
                     + [_weight_spec(w.shape, single_buffer) for w in weights],
            out_specs=pl.BlockSpec((tile_n, slab_p), lambda i: (i, 0)),
            compiler_params=pltpu.CompilerParams(
                dimension_semantics=("parallel",),
                vmem_limit_bytes=vmem),
        )(xs, x0, x1, *weights)

    try:
        out = run(True)
    except Exception:
        out = run(False)

    if slab_p != slab:
        out = out[:, :slab]
    return out.reshape(B, H, W, slab), out_dim


def split_mlp_slab(slab, out_dim):
    """Slice only what downstream actually consumes (each slice is an XLA copy)."""
    src = slab[..., :out_dim]
    s0 = slab[..., out_dim:2 * out_dim]
    s1 = slab[..., 2 * out_dim:3 * out_dim]
    fused = slab[..., 3 * out_dim:4 * out_dim]
    return src, s0, s1, fused


# ----------------------------------------------------------------------------
# Deterministic parameter construction (shapes per LoRA_Sam.__init__)
# ----------------------------------------------------------------------------

def _init(key, shape, scale=0.05):
    return scale * jax.random.normal(key, shape, dtype=jnp.float32)


def make_params(key, *, dim, r, transformer_dim):
    td = transformer_dim
    ks = list(jax.random.split(key, 40))
    k = iter(ks)

    lora = {
        "w_qkv": _init(next(k), (3 * dim, dim)),
        "b_qkv": _init(next(k), (3 * dim,)),
        # Note: reset_parameters() zeros the B matrices; we use small non-zero
        # values so the LoRA path is numerically exercised by the fold/kernel.
        "a_q": _init(next(k), (r, dim)), "b_q": _init(next(k), (dim, r)),
        "a_v": _init(next(k), (r, dim)), "b_v": _init(next(k), (dim, r)),
        "a_q2": _init(next(k), (r, dim)), "b_q2": _init(next(k), (dim, r)),
        "a_v2": _init(next(k), (r, dim)), "b_v2": _init(next(k), (dim, r)),
    }

    def mlp(kk, in_dim, hid, out_dim):
        a, b, c, d, e, f = jax.random.split(kk, 6)
        return {"w1": _init(a, (hid, in_dim)), "b1": _init(b, (hid,)),
                "w2": _init(c, (hid, hid)), "b2": _init(d, (hid,)),
                "w3": _init(e, (out_dim, hid)), "b3": _init(f, (out_dim,))}

    return {
        "lora": lora,
        "mlp_src": mlp(next(k), td, td // 8, td // 8),
        "mlp_feat_s0": mlp(next(k), td // 8, td // 8, td // 8),
        "mlp_feat_s1": mlp(next(k), td // 4, td // 8, td // 8),
        "fuse_w": _init(next(k), (td // 8, td // 8 * 3, 1, 1)),
        "fuse_b": _init(next(k), (td // 8,)),
    }


# ----------------------------------------------------------------------------
# Demo + correctness check against plain-JAX f32 reference (un-folded math)
# ----------------------------------------------------------------------------

if __name__ == "__main__":
    key = jax.random.PRNGKey(0)
    dim, r, td = 32, 4, 256       # qkv in_features, LoRA rank, transformer_dim
    B = 2
    Ha = Wa = 32                  # attention spatial: N=2048 -> 2 steps @ 1024
    Hs = Ws = 16                  # feature spatial:   N=512  -> 2 steps @ 256

    kp, kx, kf, k0, k1 = jax.random.split(key, 5)
    params = make_params(kp, dim=dim, r=r, transformer_dim=td)

    # _LoRA_qkv input: SAM2 Hiera windowed attention tensor [B, H, W, dim]
    x_attn = jax.random.normal(kx, (B, Ha, Wa, dim), dtype=jnp.float32)

    # PyTorch-layout (NCHW) feature maps; permuted ONCE to NHWC at the
    # pipeline boundary and kept channels-last end-to-end after that.
    feat_nchw = jax.random.normal(kf, (B, td, Hs, Ws), dtype=jnp.float32)
    h0_nchw = jax.random.normal(k0, (B, td // 8, Hs, Ws), dtype=jnp.float32)
    h1_nchw = jax.random.normal(k1, (B, td // 4, Hs, Ws), dtype=jnp.float32)
    feat = jnp.transpose(feat_nchw, (0, 2, 3, 1))
    h0 = jnp.transpose(h0_nchw, (0, 2, 3, 1))
    h1 = jnp.transpose(h1_nchw, (0, 2, 3, 1))

    # One-time parameter prep (LoRA fold, transposes, block-diag, bf16 casts).
    qkv_prep = prepare_qkv_params(params["lora"])
    mlp_prep = prepare_mlp_params(params)
    jax.block_until_ready((qkv_prep, mlp_prep))

    # LoRA-augmented qkv projection (folded) — the core compute this module injects.
    qkv_out = lora_qkv(x_attn, qkv_prep)

    # Three MLP heads + linear_fuse in a single fused NHWC kernel.
    slab, out_dim = mlp_heads_fused(feat, h0, h1, mlp_prep)
    jax.block_until_ready((qkv_out, slab))

    src_feat, s0_feat, s1_feat, fused = split_mlp_slab(slab, out_dim)

    # --- correctness vs. plain-JAX f32 reference of the ORIGINAL module math ---
    lp = params["lora"]
    xf = x_attn.reshape(-1, dim)
    ref_qkv = xf @ lp["w_qkv"].T + lp["b_qkv"]
    ref_q = (xf @ lp["a_q"].T) @ lp["b_q"].T + (xf @ lp["a_q2"].T) @ lp["b_q2"].T
    ref_v = (xf @ lp["a_v"].T) @ lp["b_v"].T + (xf @ lp["a_v2"].T) @ lp["b_v2"].T
    ref_qkv = ref_qkv.at[:, :dim].add(ref_q).at[:, 2 * dim:].add(ref_v)
    assert jnp.allclose(qkv_out.reshape(-1, 3 * dim).astype(jnp.float32),
                        ref_qkv, atol=3e-2, rtol=3e-2)

    def ref_mlp(x2d, p):
        h = jnp.maximum(x2d @ p["w1"].T + p["b1"], 0.0)
        h = jnp.maximum(h @ p["w2"].T + p["b2"], 0.0)
        return h @ p["w3"].T + p["b3"]

    ref_src = ref_mlp(feat.reshape(-1, td), params["mlp_src"])
    ref_s0 = ref_mlp(h0.reshape(-1, td // 8), params["mlp_feat_s0"])
    ref_s1 = ref_mlp(h1.reshape(-1, td // 4), params["mlp_feat_s1"])
    wf = params["fuse_w"].reshape(td // 8, 3 * (td // 8))
    ref_fused = (jnp.concatenate([ref_src, ref_s0, ref_s1], axis=-1) @ wf.T
                 + params["fuse_b"])

    od = td // 8
    assert jnp.allclose(src_feat.reshape(-1, od).astype(jnp.float32), ref_src,
                        atol=3e-2, rtol=3e-2)
    assert jnp.allclose(s0_feat.reshape(-1, od).astype(jnp.float32), ref_s0,
                        atol=3e-2, rtol=3e-2)
    assert jnp.allclose(s1_feat.reshape(-1, od).astype(jnp.float32), ref_s1,
                        atol=3e-2, rtol=3e-2)
    assert jnp.allclose(fused.reshape(-1, od).astype(jnp.float32), ref_fused,
                        atol=3e-2, rtol=3e-2)

    print("KERNEL_OK")
</pallas_src>

<mosaic_0001>
module attributes {stable_mosaic.version = 11 : i64} {
  func.func @_qkv_kernel(%arg0: i32, %arg1: memref<1024x32xf32, #tpu.memory_space<vmem>>, %arg2: memref<32x128xbf16, #tpu.memory_space<vmem>>, %arg3: memref<1x128xf32, #tpu.memory_space<vmem>>, %arg4: memref<1024x128xbf16, #tpu.memory_space<vmem>>) attributes {dimension_semantics = [#tpu.dimension_semantics<parallel>], iteration_bounds = array<i64: 2>, scalar_prefetch = 0 : i64, scratch_operands = 0 : i64, tpu.core_type = #tpu.core_type<tc>, window_params = [{transform_indices = @transform_0, window_bounds = array<i64: 1024, 32>}, {pipeline_mode = #tpu.pipeline_mode<synchronous>, transform_indices = @transform_1, window_bounds = array<i64: 32, 128>}, {pipeline_mode = #tpu.pipeline_mode<synchronous>, transform_indices = @transform_2, window_bounds = array<i64: 1, 128>}, {transform_indices = @transform_3, window_bounds = array<i64: 1024, 128>}]} {
    %c0 = arith.constant 0 : index
    %c0_0 = arith.constant 0 : index
    %0 = vector.load %arg1[%c0, %c0_0] : memref<1024x32xf32, #tpu.memory_space<vmem>>, vector<1024x32xf32>
    %1 = arith.truncf %0 : vector<1024x32xf32> to vector<1024x32xbf16>
    %c0_1 = arith.constant 0 : index
    %c0_2 = arith.constant 0 : index
    %2 = vector.load %arg2[%c0_1, %c0_2] : memref<32x128xbf16, #tpu.memory_space<vmem>>, vector<32x128xbf16>
    %cst = arith.constant dense<0.000000e+00> : vector<1024x128xf32>
    %3 = tpu.matmul %1, %2, %cst {dimension_numbers = #tpu.dot_dimension_numbers<[1], [0], [0], [1], [0, 0, 1, 1], [], []>} : vector<1024x32xbf16>, vector<32x128xbf16>, vector<1024x128xf32> -> vector<1024x128xf32>
    %c0_3 = arith.constant 0 : index
    %c0_4 = arith.constant 0 : index
    %4 = vector.load %arg3[%c0_3, %c0_4] : memref<1x128xf32, #tpu.memory_space<vmem>>, vector<1x128xf32>
    %5 = vector.broadcast %4 : vector<1x128xf32> to vector<1024x128xf32>
    %6 = arith.addf %3, %5 : vector<1024x128xf32>
    %7 = arith.truncf %6 : vector<1024x128xf32> to vector<1024x128xbf16>
    %c0_5 = arith.constant 0 : index
    %c0_6 = arith.constant 0 : index
    %8 = vector.load %arg4[%c0_5, %c0_6] : memref<1024x128xbf16, #tpu.memory_space<vmem>>, vector<1024x128xbf16>
    tpu.vector_store %arg4[%c0_5, %c0_6], %7 {strides = array<i32>} : memref<1024x128xbf16, #tpu.memory_space<vmem>>, vector<1024x128xbf16>,
    return
  }
  func.func @transform_0(%arg0: i32) -> (i32, i32) {
    %c0_i32 = arith.constant 0 : i32
    %c0_i32_0 = arith.constant 0 : i32
    return %arg0, %c0_i32 : i32, i32
  }
  func.func @transform_1(%arg0: i32) -> (i32, i32) {
    %c0_i32 = arith.constant 0 : i32
    %c0_i32_0 = arith.constant 0 : i32
    %c0_i32_1 = arith.constant 0 : i32
    return %c0_i32, %c0_i32_0 : i32, i32
  }
  func.func @transform_2(%arg0: i32) -> (i32, i32) {
    %c0_i32 = arith.constant 0 : i32
    %c0_i32_0 = arith.constant 0 : i32
    %c0_i32_1 = arith.constant 0 : i32
    return %c0_i32, %c0_i32_0 : i32, i32
  }
  func.func @transform_3(%arg0: i32) -> (i32, i32) {
    %c0_i32 = arith.constant 0 : i32
    %c0_i32_0 = arith.constant 0 : i32
    return %arg0, %c0_i32 : i32, i32
  }
}

module attributes {stable_mosaic.version = 11 : i64} {
  func.func @_qkv_kernel(%arg0: i32, %arg1: memref<1024x32xf32, #tpu.memory_space<vmem>>, %arg2: memref<32x128xbf16, #tpu.memory_space<vmem>>, %arg3: memref<1x128xf32, #tpu.memory_space<vmem>>, %arg4: memref<1024x128xbf16, #tpu.memory_space<vmem>>) attributes {dimension_semantics = [#tpu.dimension_semantics<parallel>], iteration_bounds = array<i64: 2>, scalar_prefetch = 0 : i64, scratch_operands = 0 : i64, tpu.core_type = #tpu.core_type<tc>, window_params = [{transform_indices = @transform_0, window_bounds = array<i64: 1024, 32>}, {pipeline_mode = #tpu.pipeline_mode<synchronous>, transform_indices = @transform_1, window_bounds = array<i64: 32, 128>}, {pipeline_mode = #tpu.pipeline_mode<synchronous>, transform_indices = @transform_2, window_bounds = array<i64: 1, 128>}, {transform_indices = @transform_3, window_bounds = array<i64: 1024, 128>}]} {
    %c0 = arith.constant 0 : index
    %c0_0 = arith.constant 0 : index
    %0 = vector.load %arg1[%c0, %c0_0] : memref<1024x32xf32, #tpu.memory_space<vmem>>, vector<1024x32xf32>
    %1 = arith.truncf %0 : vector<1024x32xf32> to vector<1024x32xbf16>
    %c0_1 = arith.constant 0 : index
    %c0_2 = arith.constant 0 : index
    %2 = vector.load %arg2[%c0_1, %c0_2] : memref<32x128xbf16, #tpu.memory_space<vmem>>, vector<32x128xbf16>
    %cst = arith.constant dense<0.000000e+00> : vector<1024x128xf32>
    %3 = tpu.matmul %1, %2, %cst {dimension_numbers = #tpu.dot_dimension_numbers<[1], [0], [0], [1], [0, 0, 1, 1], [], []>} : vector<1024x32xbf16>, vector<32x128xbf16>, vector<1024x128xf32> -> vector<1024x128xf32>
    %c0_3 = arith.constant 0 : index
    %c0_4 = arith.constant 0 : index
    %4 = vector.load %arg3[%c0_3, %c0_4] : memref<1x128xf32, #tpu.memory_space<vmem>>, vector<1x128xf32>
    %5 = vector.broadcast %4 : vector<1x128xf32> to vector<1024x128xf32>
    %6 = arith.addf %3, %5 : vector<1024x128xf32>
    %7 = arith.truncf %6 : vector<1024x128xf32> to vector<1024x128xbf16>
    %c0_5 = arith.constant 0 : index
    %c0_6 = arith.constant 0 : index
    %8 = vector.load %arg4[%c0_5, %c0_6] : memref<1024x128xbf16, #tpu.memory_space<vmem>>, vector<1024x128xbf16>
    tpu.vector_store %arg4[%c0_5, %c0_6], %7 {strides = array<i32>} : memref<1024x128xbf16, #tpu.memory_space<vmem>>, vector<1024x128xbf16>,
    return
  }
  func.func @transform_0(%arg0: i32) -> (i32, i32) {
    %c0_i32 = arith.constant 0 : i32
    %c0_i32_0 = arith.constant 0 : i32
    return %arg0, %c0_i32 : i32, i32
  }
  func.func @transform_1(%arg0: i32) -> (i32, i32) {
    %c0_i32 = arith.constant 0 : i32
    %c0_i32_0 = arith.constant 0 : i32
    %c0_i32_1 = arith.constant 0 : i32
    return %c0_i32, %c0_i32_0 : i32, i32
  }
  func.func @transform_2(%arg0: i32) -> (i32, i32) {
    %c0_i32 = arith.constant 0 : i32
    %c0_i32_0 = arith.constant 0 : i32
    %c0_i32_1 = arith.constant 0 : i32
    return %c0_i32, %c0_i32_0 : i32, i32
  }
  func.func @transform_3(%arg0: i32) -> (i32, i32) {
    %c0_i32 = arith.constant 0 : i32
    %c0_i32_0 = arith.constant 0 : i32
    return %arg0, %c0_i32 : i32, i32
  }
}

</mosaic_0001>

<bundles_post_ra>
// kernel: tpu_custom_call.1
= control target key start
LH: loop header
LB: loop body
LE: loop exit
PB: predicated region body
PF: predicated region fallthrough
CT: control target
= control target key end

     0   :  { %8 = vsyncpa [#allocation3], 0  ;;  %s3396_s0 = inlined_call_operand.vmem [shape: f32[2048,32], index: 0, kind: input, shape index: {}]   ;;  %s3397_s1 = inlined_call_operand.vmem [shape: bf16[32,128], index: 1, kind: input, shape index: {}]   ;;  %s3398_s2 = inlined_call_operand.vmem [shape: f32[1,128], index: 2, kind: input, shape index: {}]   ;;  %s3399_s3 = inlined_call_operand.hbm [shape: bf16[2048,128], index: 3, kind: output, shape index: {}]  }
   0x1   :  { %10 = vsyncpa [#allocation3 + $0x1], 0  ;;  %s2891_s12 = smov 0   ;;  %s2893_s13 = smov 0  }
   0x2   :  { %s2895_s14 = smov 0   ;;  %s2897_s15 = smov 0  }
   0x3 LB: > { %s2912_s16 = sadd.s32 4294967295, %s2866_s15   ;;  %s1842_s17 = sadd.s32 4294967294, %s2866_s15   ;;  %s2866_s15 = sphi %s2897_s15, %s3405_s15   ;;  %s2862_s14 = sphi %s2895_s14, %s3404_s14   ;;  %s2858_s13 = sphi %s2893_s13, %s3403_s13   ;;  %s2854_s12 = sphi %s2891_s12, %s3402_s12  }
   0x4   : > { %s2916_s18 = sadd.s32 1, %s2866_s15   ;;  %s91_s19 = sadd.s32 1, %s2862_s14 }
   0x5   : > { %s88_s20 = ssub.s32 %s2866_s15, %s2916_s18  ;;  %p101_p0 = scmp.ne.s32.totalorder %s2862_s14, %s2858_s13 }
   0x6   : > { %p89_p1 = scmp.eq.s32.totalorder %s88_s20, 0  ;;  %p102_p2 = scmp.eq.s32.totalorder %s2912_s16, 1 }
   0x7   : > { %p107_p3 = scmp.ne.s32.totalorder %s2858_s13, %s2854_s12  ;;  %p108_p4 = scmp.eq.s32.totalorder %s1842_s17, 1 }
   0x8   : > { %s2927_s21 = scalar_select %p89_p1, %s2862_s14, %s91_s19  }
   0x9   : > { %p2929_p5 = por %p102_p2, %p101_p0  ;;  %p2933_p6 = por %p108_p4, %p107_p3 }
   0xa   : > { %p1845_p7 = scmp.ge.s32.totalorder %s2866_s15, 1  ;;  %p141_p8 = scmp.lt.s32.totalorder %s2866_s15, 3 }
   0xc   : > { %p142_p9 = pnand %p1845_p7, %p141_p8 }
   0xd   : > { %s1847_s26 = sshll.u32 (!%p142_p9), %s2912_s16, 7  ;;  %s162_s6 = sand.u32 (!%p142_p9), 1, %s2858_s13  }
   0xe   : > { %145 = sbr.rel (%p142_p9) target bundleno = 365 (0x16d), region = 32  ;;  %p166_p10 = scmp.lt.s32.totalorder (!%p142_p9), %s1847_s26, 255 }
   0xf   : > { %s1846_s9 = sshll.u32 (!%p142_p9), %s162_s6, 9  ;;  %s2177_s11 = sshll.u32 (!%p142_p9), %s2912_s16, 13 }
  0x10   : > { %s3159_s10 = scalar_lea.vmem (!%p142_p9), [#allocation2], %s1846_s9  ;;  %s3347_s16 = scalar_lea.hbm (!%p142_p9), %s3399_s3, %s2177_s11 }
  0x11   : > { %s1780_s17 = sshll.u32 (!%p142_p9), %s3159_s10, 4  ;;  %s3356_s24 = scalar_lea.sflag (!%p142_p9), [#allocation3], %s162_s6  ;;  %s3349_s17 = int_to_ptr.vmem [resolvable:$true] %s1780_s17 }
  0x12   : > { %s2806_s25 = scalar_lea.vmem (!%p142_p9), %s3349_s17, 8192 }
  0x13   : > { %v2804_v0 = vld [vmem:[%s3397_s1 + $0x8] sm:$0xff]   ;;  %v2805_v1 = vld [vmem:[%s3397_s1] sm:$0xff]   ;;  %s3407_s26 = smov (!%p166_p10, %s1847_s26), 255  ;;  %vm388_vm0 = vcmask 261120   ;;  %p2807_p11 = scmp.ne.s32.totalorder %s3349_s17, %s2806_s25 }
  0x14   : > { %2627 = vmatprep.subr.bf16.mxu0 %v2804_v0  ;;  %2759 = vmatprep.subr.bf16.mxu1 %v2804_v0  ;;  %s1848_s29 = sshll.u32 %s3407_s26, 3  ;;  %s2868_s26 = smov [#allocation2]  }
  0x15   : > { %2628 = vmatpush3.bf16.msra.mxu0 %v2804_v0  ;;  %2761 = vmatpush3.bf16.msra.mxu1 %v2804_v0  ;;  %s2949_s5 = scalar_lea.vmem %s3396_s0, %s1848_s29  ;;  %p2808_p12 = pnand %p2807_p11, %p2929_p5 }
  0x16   : > { %2629 = vmatprep.subr.bf16.mxu0 %v2805_v1  ;;  %2760 = vmatprep.subr.bf16.mxu1 %v2805_v1  ;;  %v173_v2 = vld [vmem:[%s2949_s5] sm:$0xff]  ;;  %v174_v3 = vld [vmem:[%s2949_s5 + $0x8] sm:$0xff]  ;;  %v175_v7 = vld [vmem:[%s2949_s5 + $0x10] sm:$0xff]  ;;  %s2810_s27 = sshll.u32 %s2868_s26, 4  ;;  %s2811_s27 = int_to_ptr.vmem [resolvable:$false] %s2810_s27 }
  0x17   : > { %v237_v4 = vld [vmem:[%s2949_s5 + $0x200] sm:$0xff]  ;;  %v301_v5 = vpack.c.bf16 %v174_v3, %v173_v2  ;;  %v238_v6 = vld [vmem:[%s2949_s5 + $0x208] sm:$0xff]  ;;  %v176_v8 = vld [vmem:[%s2949_s5 + $0x18] sm:$0xff]  ;;  %p2809_p13 = pneg %p2808_p12  ;;  %s2812_s28 = scalar_lea.vmem %s2811_s27, 16384 }
  0x18   : > { %v333_v9 = vpack.c.bf16 %v238_v6, %v237_v4  ;;  %v302_v10 = vpack.c.bf16 %v176_v8, %v175_v7  ;;  %v239_v11 = vld [vmem:[%s2949_s5 + $0x210] sm:$0xff]  ;;  %v240_v12 = vld [vmem:[%s2949_s5 + $0x218] sm:$0xff]  ;;  %v177_v13 = vld [vmem:[%s2949_s5 + $0x20] sm:$0xff]  ;;  %p2813_p0 = scmp.lt.s32.totalorder %s3349_s17, %s2811_s27  ;;  %p2814_p1 = scmp.lt.s32.totalorder %s2812_s28, %s2806_s25 }
  0x19   : > { %2630 = vmatpush3.bf16.msra.mxu0 %v2805_v1  ;;  %2762 = vmatpush3.bf16.msra.mxu1 %v2805_v1  ;;  %v334_v14 = vpack.c.bf16 %v240_v12, %v239_v11  ;;  %v178_v15 = vld [vmem:[%s2949_s5 + $0x28] sm:$0xff]  ;;  %v241_v16 = vld [vmem:[%s2949_s5 + $0x220] sm:$0xff]  ;;  %v179_v20 = vld [vmem:[%s2949_s5 + $0x30] sm:$0xff] }
  0x1a   : > { %2631 = vmatprep.mubr.msk.bf16.mxu0 %vm388_vm0, %v301_v5  ;;  %v242_v17 = vld [vmem:[%s2949_s5 + $0x228] sm:$0xff]  ;;  %2695 = vmatprep.mubr.msk.bf16.mxu1 %vm388_vm0, %v333_v9  ;;  %v303_v18 = vpack.c.bf16 %v178_v15, %v177_v13  ;;  %v180_v21 = vld [vmem:[%s2949_s5 + $0x38] sm:$0xff]  ;;  %v243_v22 = vld [vmem:[%s2949_s5 + $0x230] sm:$0xff]  ;;  %p2815_p2 = por %p2814_p1, %p2813_p0 }
  0x1b   : > { %v335_v19 = vpack.c.bf16 %v242_v17, %v241_v16  ;;  %v244_v23 = vld [vmem:[%s2949_s5 + $0x238] sm:$0xff]  ;;  %v181_v24 = vld [vmem:[%s2949_s5 + $0x40] sm:$0xff]  ;;  %v182_v25 = vld [vmem:[%s2949_s5 + $0x48] sm:$0xff]  ;;  %v304_v28 = vpack.c.bf16 %v180_v21, %v179_v20 }
  0x1c   : > { %2632 = vmatmul.mubr.msk.bf16.vlgmr.msra.gmra.mxu0 %vm388_vm0, %v302_v10  ;;  %2696 = vmatmul.mubr.msk.bf16.vlgmr.msra.gmra.mxu1 %vm388_vm0, %v334_v14  ;;  %v245_v26 = vld [vmem:[%s2949_s5 + $0x240] sm:$0xff]  ;;  %v246_v27 = vld [vmem:[%s2949_s5 + $0x248] sm:$0xff]  ;;  %v336_v29 = vpack.c.bf16 %v244_v23, %v243_v22  ;;  %v305_v30 = vpack.c.bf16 %v182_v25, %v181_v24  ;;  %v183_v32 = vld [vmem:[%s2949_s5 + $0x50] sm:$0xff]  ;;  %p2816_p3 = pnand %p2815_p2, %p2809_p13 }
  0x1d   : > { %2635 = vmatprep.mubr.msk.bf16.mxu0 %vm388_vm0, %v303_v18  ;;  %2699 = vmatprep.mubr.msk.bf16.mxu1 %vm388_vm0, %v335_v19  ;;  %v337_v31 = vpack.c.bf16 %v246_v27, %v245_v26  ;;  %v184_v33 = vld [vmem:[%s2949_s5 + $0x58] sm:$0xff]  ;;  %v247_v34 = vld [vmem:[%s2949_s5 + $0x250] sm:$0xff]  ;;  %v185_v36 = vld [vmem:[%s2949_s5 + $0x60] sm:$0xff] }
  0x1e   : > { %v248_v35 = vld [vmem:[%s2949_s5 + $0x258] sm:$0xff]  ;;  %v186_v37 = vld [vmem:[%s2949_s5 + $0x68] sm:$0xff]  ;;  %v249_v38 = vld [vmem:[%s2949_s5 + $0x260] sm:$0xff]  ;;  %v306_v40 = vpack.c.bf16 %v184_v33, %v183_v32 }
  0x1f   : > { %v250_v39 = vld [vmem:[%s2949_s5 + $0x268] sm:$0xff]  ;;  %v338_v41 = vpack.c.bf16 %v248_v35, %v247_v34  ;;  %v307_v42 = vpack.c.bf16 %v186_v37, %v185_v36  ;;  %v187_v44 = vld [vmem:[%s2949_s5 + $0x70] sm:$0xff]  ;;  %v188_v45 = vld [vmem:[%s2949_s5 + $0x78] sm:$0xff] }
  0x20   : > { %v339_v43 = vpack.c.bf16 %v250_v39, %v249_v38  ;;  %v251_v46 = vld [vmem:[%s2949_s5 + $0x270] sm:$0xff]  ;;  %v252_v47 = vld [vmem:[%s2949_s5 + $0x278] sm:$0xff]  ;;  %v189_v48 = vld [vmem:[%s2949_s5 + $0x80] sm:$0xff]  ;;  %v308_v52 = vpack.c.bf16 %v188_v45, %v187_v44 }
  0x21   : > { %v190_v49 = vld [vmem:[%s2949_s5 + $0x88] sm:$0xff]  ;;  %v253_v50 = vld [vmem:[%s2949_s5 + $0x280] sm:$0xff]  ;;  %v340_v53 = vpack.c.bf16 %v252_v47, %v251_v46  ;;  %v191_v56 = vld [vmem:[%s2949_s5 + $0x90] sm:$0xff] }
  0x22   : > { %v254_v51 = vld [vmem:[%s2949_s5 + $0x288] sm:$0xff]  ;;  %v309_v54 = vpack.c.bf16 %v190_v49, %v189_v48  ;;  %v192_v57 = vld [vmem:[%s2949_s5 + $0x98] sm:$0xff]  ;;  %v255_v58 = vld [vmem:[%s2949_s5 + $0x290] sm:$0xff] }
  0x23   : > { %v341_v55 = vpack.c.bf16 %v254_v51, %v253_v50  ;;  %v256_v59 = vld [vmem:[%s2949_s5 + $0x298] sm:$0xff]  ;;  %v193_v60 = vld [vmem:[%s2949_s5 + $0xa0] sm:$0xff]  ;;  %v194_v61 = vld [vmem:[%s2949_s5 + $0xa8] sm:$0xff]  ;;  %v310_v0 = vpack.c.bf16 %v192_v57, %v191_v56 }
  0x24   : > { %2636 = vmatmul.mubr.msk.bf16.gmra.mxu0 %vm388_vm0, %v304_v28  ;;  %2700 = vmatmul.mubr.msk.bf16.gmra.mxu1 %vm388_vm0, %v336_v29  ;;  %v257_v62 = vld [vmem:[%s2949_s5 + $0x2a0] sm:$0xff]  ;;  %v258_v63 = vld [vmem:[%s2949_s5 + $0x2a8] sm:$0xff]  ;;  %v342_v1 = vpack.c.bf16 %v256_v59, %v255_v58  ;;  %v311_v2 = vpack.c.bf16 %v194_v61, %v193_v60  ;;  %v195_v4 = vld [vmem:[%s2949_s5 + $0xb0] sm:$0xff] }
  0x25   : > { %2639 = vmatprep.mubr.msk.bf16.mxu0 %vm388_vm0, %v305_v30  ;;  %2703 = vmatprep.mubr.msk.bf16.mxu1 %vm388_vm0, %v337_v31  ;;  %v343_v3 = vpack.c.bf16 %v258_v63, %v257_v62  ;;  %v196_v5 = vld [vmem:[%s2949_s5 + $0xb8] sm:$0xff]  ;;  %v259_v6 = vld [vmem:[%s2949_s5 + $0x2b0] sm:$0xff]  ;;  %v197_v8 = vld [vmem:[%s2949_s5 + $0xc0] sm:$0xff] }
  0x26   : > { %v260_v7 = vld [vmem:[%s2949_s5 + $0x2b8] sm:$0xff]  ;;  %v198_v9 = vld [vmem:[%s2949_s5 + $0xc8] sm:$0xff]  ;;  %v261_v10 = vld [vmem:[%s2949_s5 + $0x2c0] sm:$0xff]  ;;  %v312_v12 = vpack.c.bf16 %v196_v5, %v195_v4 }
  0x27   : > { %v262_v11 = vld [vmem:[%s2949_s5 + $0x2c8] sm:$0xff]  ;;  %v344_v13 = vpack.c.bf16 %v260_v7, %v259_v6  ;;  %v313_v14 = vpack.c.bf16 %v198_v9, %v197_v8  ;;  %v199_v16 = vld [vmem:[%s2949_s5 + $0xd0] sm:$0xff]  ;;  %v200_v17 = vld [vmem:[%s2949_s5 + $0xd8] sm:$0xff] }
  0x28   : > { %v345_v15 = vpack.c.bf16 %v262_v11, %v261_v10  ;;  %v263_v18 = vld [vmem:[%s2949_s5 + $0x2d0] sm:$0xff]  ;;  %v264_v19 = vld [vmem:[%s2949_s5 + $0x2d8] sm:$0xff]  ;;  %v201_v20 = vld [vmem:[%s2949_s5 + $0xe0] sm:$0xff]  ;;  %v314_v24 = vpack.c.bf16 %v200_v17, %v199_v16 }
  0x29   : > { %v202_v21 = vld [vmem:[%s2949_s5 + $0xe8] sm:$0xff]  ;;  %v265_v22 = vld [vmem:[%s2949_s5 + $0x2e0] sm:$0xff]  ;;  %v346_v25 = vpack.c.bf16 %v264_v19, %v263_v18  ;;  %v203_v28 = vld [vmem:[%s2949_s5 + $0xf0] sm:$0xff] }
  0x2a   : > { %v266_v23 = vld [vmem:[%s2949_s5 + $0x2e8] sm:$0xff]  ;;  %v315_v26 = vpack.c.bf16 %v202_v21, %v201_v20  ;;  %v204_v29 = vld [vmem:[%s2949_s5 + $0xf8] sm:$0xff]  ;;  %v267_v30 = vld [vmem:[%s2949_s5 + $0x2f0] sm:$0xff] }
  0x2b   : > { %v347_v27 = vpack.c.bf16 %v266_v23, %v265_v22  ;;  %v268_v31 = vld [vmem:[%s2949_s5 + $0x2f8] sm:$0xff]  ;;  %v205_v32 = vld [vmem:[%s2949_s5 + $0x100] sm:$0xff]  ;;  %v206_v33 = vld [vmem:[%s2949_s5 + $0x108] sm:$0xff]  ;;  %v316_v36 = vpack.c.bf16 %v204_v29, %v203_v28 }
  0x2c   : > { %2640 = vmatmul.mubr.msk.bf16.gmra.mxu0 %vm388_vm0, %v306_v40  ;;  %2704 = vmatmul.mubr.msk.bf16.gmra.mxu1 %vm388_vm0, %v338_v41  ;;  %v269_v34 = vld [vmem:[%s2949_s5 + $0x300] sm:$0xff]  ;;  %v270_v35 = vld [vmem:[%s2949_s5 + $0x308] sm:$0xff]  ;;  %v348_v37 = vpack.c.bf16 %v268_v31, %v267_v30  ;;  %v317_v38 = vpack.c.bf16 %v206_v33, %v205_v32  ;;  %v207_v40 = vld [vmem:[%s2949_s5 + $0x110] sm:$0xff] }
  0x2d   : > { %2643 = vmatprep.mubr.msk.bf16.mxu0 %vm388_vm0, %v307_v42  ;;  %2707 = vmatprep.mubr.msk.bf16.mxu1 %vm388_vm0, %v339_v43  ;;  %v349_v39 = vpack.c.bf16 %v270_v35, %v269_v34  ;;  %v208_v41 = vld [vmem:[%s2949_s5 + $0x118] sm:$0xff]  ;;  %v271_v42 = vld [vmem:[%s2949_s5 + $0x310] sm:$0xff]  ;;  %v209_v44 = vld [vmem:[%s2949_s5 + $0x120] sm:$0xff] }
  0x2e   : > { %v272_v43 = vld [vmem:[%s2949_s5 + $0x318] sm:$0xff]  ;;  %v210_v45 = vld [vmem:[%s2949_s5 + $0x128] sm:$0xff]  ;;  %v273_v46 = vld [vmem:[%s2949_s5 + $0x320] sm:$0xff]  ;;  %v318_v48 = vpack.c.bf16 %v208_v41, %v207_v40 }
  0x2f   : > { %v274_v47 = vld [vmem:[%s2949_s5 + $0x328] sm:$0xff]  ;;  %v350_v49 = vpack.c.bf16 %v272_v43, %v271_v42  ;;  %v319_v50 = vpack.c.bf16 %v210_v45, %v209_v44  ;;  %v213_v56 = vld [vmem:[%s2949_s5 + $0x140] sm:$0xff] }
  0x30   : > { %v351_v51 = vpack.c.bf16 %v274_v47, %v273_v46  ;;  %v214_v57 = vld [vmem:[%s2949_s5 + $0x148] sm:$0xff]  ;;  %v277_v58 = vld [vmem:[%s2949_s5 + $0x340] sm:$0xff] }
  0x31   : > { %v278_v59 = vld [vmem:[%s2949_s5 + $0x348] sm:$0xff]  ;;  %v321_v62 = vpack.c.bf16 %v214_v57, %v213_v56  ;;  %v217_v4 = vld [vmem:[%s2949_s5 + $0x160] sm:$0xff] }
  0x32   : > { %v353_v63 = vpack.c.bf16 %v278_v59, %v277_v58  ;;  %v218_v5 = vld [vmem:[%s2949_s5 + $0x168] sm:$0xff]  ;;  %v281_v6 = vld [vmem:[%s2949_s5 + $0x360] sm:$0xff] }
  0x33   : > { %v282_v7 = vld [vmem:[%s2949_s5 + $0x368] sm:$0xff]  ;;  %v323_v10 = vpack.c.bf16 %v218_v5, %v217_v4  ;;  %v221_v16 = vld [vmem:[%s2949_s5 + $0x180] sm:$0xff] }
  0x34   : > { %2644 = vmatmul.mubr.msk.bf16.gmra.mxu0 %vm388_vm0, %v308_v52  ;;  %2708 = vmatmul.mubr.msk.bf16.gmra.mxu1 %vm388_vm0, %v340_v53  ;;  %v211_v52 = vld [vmem:[%s2949_s5 + $0x130] sm:$0xff]  ;;  %v212_v53 = vld [vmem:[%s2949_s5 + $0x138] sm:$0xff]  ;;  %v355_v11 = vpack.c.bf16 %v282_v7, %v281_v6  ;;  %v222_v17 = vld [vmem:[%s2949_s5 + $0x188] sm:$0xff] }
  0x35   : > { %2647 = vmatprep.mubr.msk.bf16.mxu0 %vm388_vm0, %v309_v54  ;;  %2711 = vmatprep.mubr.msk.bf16.mxu1 %vm388_vm0, %v341_v55  ;;  %v275_v54 = vld [vmem:[%s2949_s5 + $0x330] sm:$0xff]  ;;  %v276_v55 = vld [vmem:[%s2949_s5 + $0x338] sm:$0xff]  ;;  %v320_v60 = vpack.c.bf16 %v212_v53, %v211_v52  ;;  %v285_v18 = vld [vmem:[%s2949_s5 + $0x380] sm:$0xff]  ;;  %v325_v22 = vpack.c.bf16 %v222_v17, %v221_v16 }
  0x36   : > { %v352_v61 = vpack.c.bf16 %v276_v55, %v275_v54  ;;  %v286_v19 = vld [vmem:[%s2949_s5 + $0x388] sm:$0xff]  ;;  %v225_v28 = vld [vmem:[%s2949_s5 + $0x1a0] sm:$0xff] }
  0x37   : > { %v357_v23 = vpack.c.bf16 %v286_v19, %v285_v18  ;;  %v226_v29 = vld [vmem:[%s2949_s5 + $0x1a8] sm:$0xff]  ;;  %v289_v30 = vld [vmem:[%s2949_s5 + $0x3a0] sm:$0xff] }
  0x38   : > { %v290_v31 = vld [vmem:[%s2949_s5 + $0x3a8] sm:$0xff]  ;;  %v327_v34 = vpack.c.bf16 %v226_v29, %v225_v28  ;;  %v229_v40 = vld [vmem:[%s2949_s5 + $0x1c0] sm:$0xff] }
  0x39   : > { %v359_v35 = vpack.c.bf16 %v290_v31, %v289_v30  ;;  %v230_v41 = vld [vmem:[%s2949_s5 + $0x1c8] sm:$0xff]  ;;  %v293_v42 = vld [vmem:[%s2949_s5 + $0x3c0] sm:$0xff] }
  0x3a   : > { %v294_v43 = vld [vmem:[%s2949_s5 + $0x3c8] sm:$0xff]  ;;  %v329_v46 = vpack.c.bf16 %v230_v41, %v229_v40  ;;  %v233_v52 = vld [vmem:[%s2949_s5 + $0x1e0] sm:$0xff] }
  0x3b   : > { %v361_v47 = vpack.c.bf16 %v294_v43, %v293_v42  ;;  %v234_v53 = vld [vmem:[%s2949_s5 + $0x1e8] sm:$0xff]  ;;  %v297_v54 = vld [vmem:[%s2949_s5 + $0x3e0] sm:$0xff] }
  0x3c   : > { %2648 = vmatmul.mubr.msk.bf16.gmra.mxu0 %vm388_vm0, %v310_v0  ;;  %2712 = vmatmul.mubr.msk.bf16.gmra.mxu1 %vm388_vm0, %v342_v1  ;;  %v215_v0 = vld [vmem:[%s2949_s5 + $0x150] sm:$0xff]  ;;  %v216_v1 = vld [vmem:[%s2949_s5 + $0x158] sm:$0xff]  ;;  %v298_v55 = vld [vmem:[%s2949_s5 + $0x3e8] sm:$0xff]  ;;  %v331_v58 = vpack.c.bf16 %v234_v53, %v233_v52 }
  0x3d   : > { %2651 = vmatprep.mubr.msk.bf16.mxu0 %vm388_vm0, %v311_v2  ;;  %2715 = vmatprep.mubr.msk.bf16.mxu1 %vm388_vm0, %v343_v3  ;;  %v279_v2 = vld [vmem:[%s2949_s5 + $0x350] sm:$0xff]  ;;  %v280_v3 = vld [vmem:[%s2949_s5 + $0x358] sm:$0xff]  ;;  %v322_v8 = vpack.c.bf16 %v216_v1, %v215_v0  ;;  %v363_v59 = vpack.c.bf16 %v298_v55, %v297_v54  ;;  %v3147_v4 = vld [vmem:[%s3398_s2] ss:$0 sm:$0xff] }
  0x3e   : > { %v354_v9 = vpack.c.bf16 %v280_v3, %v279_v2 }
  0x44   : > { %2652 = vmatmul.mubr.msk.bf16.gmra.mxu0 %vm388_vm0, %v312_v12  ;;  %2716 = vmatmul.mubr.msk.bf16.gmra.mxu1 %vm388_vm0, %v344_v13  ;;  %v219_v12 = vld [vmem:[%s2949_s5 + $0x170] sm:$0xff]  ;;  %v220_v13 = vld [vmem:[%s2949_s5 + $0x178] sm:$0xff] }
  0x45   : > { %2655 = vmatprep.mubr.msk.bf16.mxu0 %vm388_vm0, %v313_v14  ;;  %2719 = vmatprep.mubr.msk.bf16.mxu1 %vm388_vm0, %v345_v15  ;;  %v283_v14 = vld [vmem:[%s2949_s5 + $0x370] sm:$0xff]  ;;  %v284_v15 = vld [vmem:[%s2949_s5 + $0x378] sm:$0xff]  ;;  %v324_v20 = vpack.c.bf16 %v220_v13, %v219_v12 }
  0x46   : > { %v356_v21 = vpack.c.bf16 %v284_v15, %v283_v14 }
  0x4c   : > { %2656 = vmatmul.mubr.msk.bf16.gmra.mxu0 %vm388_vm0, %v314_v24  ;;  %2720 = vmatmul.mubr.msk.bf16.gmra.mxu1 %vm388_vm0, %v346_v25  ;;  %v223_v24 = vld [vmem:[%s2949_s5 + $0x190] sm:$0xff]  ;;  %v224_v25 = vld [vmem:[%s2949_s5 + $0x198] sm:$0xff] }
  0x4d   : > { %2659 = vmatprep.mubr.msk.bf16.mxu0 %vm388_vm0, %v315_v26  ;;  %2723 = vmatprep.mubr.msk.bf16.mxu1 %vm388_vm0, %v347_v27  ;;  %v287_v26 = vld [vmem:[%s2949_s5 + $0x390] sm:$0xff]  ;;  %v288_v27 = vld [vmem:[%s2949_s5 + $0x398] sm:$0xff]  ;;  %v326_v32 = vpack.c.bf16 %v224_v25, %v223_v24 }
  0x4e   : > { %v358_v33 = vpack.c.bf16 %v288_v27, %v287_v26 }
  0x54   : > { %2660 = vmatmul.mubr.msk.bf16.gmra.mxu0 %vm388_vm0, %v316_v36  ;;  %2724 = vmatmul.mubr.msk.bf16.gmra.mxu1 %vm388_vm0, %v348_v37  ;;  %v227_v36 = vld [vmem:[%s2949_s5 + $0x1b0] sm:$0xff]  ;;  %v228_v37 = vld [vmem:[%s2949_s5 + $0x1b8] sm:$0xff] }
  0x55   : > { %2663 = vmatprep.mubr.msk.bf16.mxu0 %vm388_vm0, %v317_v38  ;;  %2727 = vmatprep.mubr.msk.bf16.mxu1 %vm388_vm0, %v349_v39  ;;  %v291_v38 = vld [vmem:[%s2949_s5 + $0x3b0] sm:$0xff]  ;;  %v292_v39 = vld [vmem:[%s2949_s5 + $0x3b8] sm:$0xff]  ;;  %v328_v44 = vpack.c.bf16 %v228_v37, %v227_v36 }
  0x56   : > { %v360_v45 = vpack.c.bf16 %v292_v39, %v291_v38 }
  0x5c   : > { %2664 = vmatmul.mubr.msk.bf16.gmra.mxu0 %vm388_vm0, %v318_v48  ;;  %2728 = vmatmul.mubr.msk.bf16.gmra.mxu1 %vm388_vm0, %v350_v49  ;;  %v231_v48 = vld [vmem:[%s2949_s5 + $0x1d0] sm:$0xff]  ;;  %v232_v49 = vld [vmem:[%s2949_s5 + $0x1d8] sm:$0xff] }
  0x5d   : > { %2667 = vmatprep.mubr.msk.bf16.mxu0 %vm388_vm0, %v319_v50  ;;  %2731 = vmatprep.mubr.msk.bf16.mxu1 %vm388_vm0, %v351_v51  ;;  %v295_v50 = vld [vmem:[%s2949_s5 + $0x3d0] sm:$0xff]  ;;  %v296_v51 = vld [vmem:[%s2949_s5 + $0x3d8] sm:$0xff]  ;;  %v330_v56 = vpack.c.bf16 %v232_v49, %v231_v48 }
  0x5e   : > { %v362_v57 = vpack.c.bf16 %v296_v51, %v295_v50 }
  0x64   : > { %2668 = vmatmul.mubr.msk.bf16.gmra.mxu0 %vm388_vm0, %v320_v60  ;;  %2732 = vmatmul.mubr.msk.bf16.gmra.mxu1 %vm388_vm0, %v352_v61  ;;  %v235_v60 = vld [vmem:[%s2949_s5 + $0x1f0] sm:$0xff]  ;;  %v236_v61 = vld [vmem:[%s2949_s5 + $0x1f8] sm:$0xff] }
  0x65   : > { %2671 = vmatprep.mubr.msk.bf16.mxu0 %vm388_vm0, %v321_v62  ;;  %2735 = vmatprep.mubr.msk.bf16.mxu1 %vm388_vm0, %v353_v63  ;;  %v299_v62 = vld [vmem:[%s2949_s5 + $0x3f0] sm:$0xff]  ;;  %v300_v63 = vld [vmem:[%s2949_s5 + $0x3f8] sm:$0xff]  ;;  %v332_v0 = vpack.c.bf16 %v236_v61, %v235_v60 }
  0x66   : > { %v364_v1 = vpack.c.bf16 %v300_v63, %v299_v62 }
  0x6c   : > { %2672 = vmatmul.mubr.msk.bf16.gmra.mxu0 %vm388_vm0, %v322_v8  ;;  %2736 = vmatmul.mubr.msk.bf16.gmra.mxu1 %vm388_vm0, %v354_v9 }
  0x6d   : > { %2675 = vmatprep.mubr.msk.bf16.mxu0 %vm388_vm0, %v323_v10  ;;  %2739 = vmatprep.mubr.msk.bf16.mxu1 %vm388_vm0, %v355_v11 }
  0x74   : > { %2676 = vmatmul.mubr.msk.bf16.gmra.mxu0 %vm388_vm0, %v324_v20  ;;  %2740 = vmatmul.mubr.msk.bf16.gmra.mxu1 %vm388_vm0, %v356_v21 }
  0x75   : > { %2679 = vmatprep.mubr.msk.bf16.mxu0 %vm388_vm0, %v325_v22  ;;  %2743 = vmatprep.mubr.msk.bf16.mxu1 %vm388_vm0, %v357_v23 }
  0x7c   : > { %2680 = vmatmul.mubr.msk.bf16.gmra.mxu0 %vm388_vm0, %v326_v32  ;;  %2744 = vmatmul.mubr.msk.bf16.gmra.mxu1 %vm388_vm0, %v358_v33 }
  0x7d   : > { %2683 = vmatprep.mubr.msk.bf16.mxu0 %vm388_vm0, %v327_v34  ;;  %2747 = vmatprep.mubr.msk.bf16.mxu1 %vm388_vm0, %v359_v35 }
  0x84   : > { %2684 = vmatmul.mubr.msk.bf16.gmra.mxu0 %vm388_vm0, %v328_v44  ;;  %2748 = vmatmul.mubr.msk.bf16.gmra.mxu1 %vm388_vm0, %v360_v45 }
  0x85   : > { %2687 = vmatprep.mubr.msk.bf16.mxu0 %vm388_vm0, %v329_v46  ;;  %2751 = vmatprep.mubr.msk.bf16.mxu1 %vm388_vm0, %v361_v47 }
  0x8c   : > { %2688 = vmatmul.mubr.msk.bf16.gmra.mxu0 %vm388_vm0, %v330_v56  ;;  %2752 = vmatmul.mubr.msk.bf16.gmra.mxu1 %vm388_vm0, %v362_v57 }
  0x8d   : > { %2691 = vmatprep.mubr.msk.bf16.mxu0 %vm388_vm0, %v331_v58  ;;  %2755 = vmatprep.mubr.msk.bf16.mxu1 %vm388_vm0, %v363_v59 }
  0x94   : > { %2692 = vmatmul.mubr.msk.bf16.gmra.mxu0 %vm388_vm0, %v332_v0  ;;  %2756 = vmatmul.mubr.msk.bf16.gmra.mxu1 %vm388_vm0, %v364_v1 }
  0xdc   : > { %v2633_v2 = vpop.f32.mrf.mxu0  ;;  %v2697_v3 = vpop.f32.mrf.mxu1 }
  0xdd   : > { %v624_v8 = vadd.f32 %v2633_v2, %v3147_v4  ;;  %v880_v11 = vadd.f32 %v2697_v3, %v3147_v4 }
  0xde   : > { %v615_v5 = vpop.f32.mrf.mxu0  ;;  %v871_v6 = vpop.f32.mrf.mxu1 }
  0xdf   : > { %v616_v14 = vadd.f32 %v3147_v4, %v615_v5  ;;  %v872_v18 = vadd.f32 %v3147_v4, %v871_v6 }
  0xe0   : > { %v2634_v7 = vpop.f32.mrf.mxu0  ;;  %v2698_v10 = vpop.f32.mrf.mxu1 }
  0xe1   : > { %v627_v9 = vadd.f32 %v2634_v7, %v3147_v4  ;;  %v883_v12 = vadd.f32 %v2698_v10, %v3147_v4 }
  0xe2   : > { %v618_v13 = vpop.f32.mrf.mxu0  ;;  %v874_v17 = vpop.f32.mrf.mxu1 }
  0xe3   : > { %v2186_v15 = vpack.c.bf16 %v627_v9, %v624_v8  ;;  %v619_v16 = vadd.f32 %v3147_v4, %v618_v13  ;;  %v2346_v19 = vpack.c.bf16 %v883_v12, %v880_v11  ;;  %v875_v20 = vadd.f32 %v3147_v4, %v874_v17 }
  0xe4   : > { %v2637_v21 = vpop.f32.mrf.mxu0  ;;  %v2701_v23 = vpop.f32.mrf.mxu1 }
  0xe5   : > { %2498 = vst [vmem:[%s3159_s10 + $0x8] sm:$0xff] %v2186_v15   ;;  %v2181_v22 = vpack.c.bf16 %v619_v16, %v616_v14  ;;  %2530 = vst [vmem:[%s3159_s10 + $0x108] sm:$0xff] %v2346_v19   ;;  %v2341_v24 = vpack.c.bf16 %v875_v20, %v872_v18  ;;  %v640_v28 = vadd.f32 %v2637_v21, %v3147_v4 }
  0xe6   : > { %v631_v25 = vpop.f32.mrf.mxu0  ;;  %v887_v26 = vpop.f32.mrf.mxu1  ;;  %v896_v31 = vadd.f32 %v2701_v23, %v3147_v4 }
  0xe7   : > { %2182 = vst [vmem:[%s3159_s10] sm:$0xff] %v2181_v22   ;;  %2529 = vst [vmem:[%s3159_s10 + $0x100] sm:$0xff] %v2341_v24   ;;  %v632_v34 = vadd.f32 %v3147_v4, %v631_v25  ;;  %v888_v38 = vadd.f32 %v3147_v4, %v887_v26 }
  0xe8   : > { %v2638_v27 = vpop.f32.mrf.mxu0  ;;  %v2702_v30 = vpop.f32.mrf.mxu1 }
  0xe9   : > { %v643_v29 = vadd.f32 %v2638_v27, %v3147_v4  ;;  %v899_v32 = vadd.f32 %v2702_v30, %v3147_v4 }
  0xea   : > { %v634_v33 = vpop.f32.mrf.mxu0  ;;  %v890_v37 = vpop.f32.mrf.mxu1 }
  0xeb   : > { %v2196_v35 = vpack.c.bf16 %v643_v29, %v640_v28  ;;  %v635_v36 = vadd.f32 %v3147_v4, %v634_v33  ;;  %v2356_v39 = vpack.c.bf16 %v899_v32, %v896_v31  ;;  %v891_v40 = vadd.f32 %v3147_v4, %v890_v37 }
  0xec   : > { %v2641_v41 = vpop.f32.mrf.mxu0  ;;  %v2705_v43 = vpop.f32.mrf.mxu1 }
  0xed   : > { %2500 = vst [vmem:[%s3159_s10 + $0x18] sm:$0xff] %v2196_v35   ;;  %v2191_v42 = vpack.c.bf16 %v635_v36, %v632_v34  ;;  %2532 = vst [vmem:[%s3159_s10 + $0x118] sm:$0xff] %v2356_v39   ;;  %v2351_v44 = vpack.c.bf16 %v891_v40, %v888_v38  ;;  %v656_v48 = vadd.f32 %v2641_v41, %v3147_v4 }
  0xee   : > { %v647_v45 = vpop.f32.mrf.mxu0  ;;  %v903_v46 = vpop.f32.mrf.mxu1  ;;  %v912_v51 = vadd.f32 %v2705_v43, %v3147_v4 }
  0xef   : > { %2499 = vst [vmem:[%s3159_s10 + $0x10] sm:$0xff] %v2191_v42   ;;  %2531 = vst [vmem:[%s3159_s10 + $0x110] sm:$0xff] %v2351_v44   ;;  %v648_v54 = vadd.f32 %v3147_v4, %v647_v45  ;;  %v904_v58 = vadd.f32 %v3147_v4, %v903_v46 }
  0xf0   : > { %v2642_v47 = vpop.f32.mrf.mxu0  ;;  %v2706_v50 = vpop.f32.mrf.mxu1 }
  0xf1   : > { %v659_v49 = vadd.f32 %v2642_v47, %v3147_v4  ;;  %v915_v52 = vadd.f32 %v2706_v50, %v3147_v4 }
  0xf2   : > { %v650_v53 = vpop.f32.mrf.mxu0  ;;  %v906_v57 = vpop.f32.mrf.mxu1 }
  0xf3   : > { %v2206_v55 = vpack.c.bf16 %v659_v49, %v656_v48  ;;  %v651_v56 = vadd.f32 %v3147_v4, %v650_v53  ;;  %v2366_v59 = vpack.c.bf16 %v915_v52, %v912_v51  ;;  %v907_v60 = vadd.f32 %v3147_v4, %v906_v57 }
  0xf4   : > { %v2645_v61 = vpop.f32.mrf.mxu0  ;;  %v2709_v63 = vpop.f32.mrf.mxu1 }
  0xf5   : > { %2502 = vst [vmem:[%s3159_s10 + $0x28] sm:$0xff] %v2206_v55   ;;  %v2201_v62 = vpack.c.bf16 %v651_v56, %v648_v54  ;;  %2534 = vst [vmem:[%s3159_s10 + $0x128] sm:$0xff] %v2366_v59   ;;  %v2361_v0 = vpack.c.bf16 %v907_v60, %v904_v58  ;;  %v672_v5 = vadd.f32 %v2645_v61, %v3147_v4 }
  0xf6   : > { %v663_v1 = vpop.f32.mrf.mxu0  ;;  %v919_v2 = vpop.f32.mrf.mxu1  ;;  %v928_v8 = vadd.f32 %v2709_v63, %v3147_v4 }
  0xf7   : > { %2501 = vst [vmem:[%s3159_s10 + $0x20] sm:$0xff] %v2201_v62   ;;  %2533 = vst [vmem:[%s3159_s10 + $0x120] sm:$0xff] %v2361_v0   ;;  %v664_v11 = vadd.f32 %v3147_v4, %v663_v1  ;;  %v920_v15 = vadd.f32 %v3147_v4, %v919_v2 }
  0xf8   : > { %v2646_v3 = vpop.f32.mrf.mxu0  ;;  %v2710_v7 = vpop.f32.mrf.mxu1 }
  0xf9   : > { %v675_v6 = vadd.f32 %v2646_v3, %v3147_v4  ;;  %v931_v9 = vadd.f32 %v2710_v7, %v3147_v4 }
  0xfa   : > { %v666_v10 = vpop.f32.mrf.mxu0  ;;  %v922_v14 = vpop.f32.mrf.mxu1 }
  0xfb   : > { %v2216_v12 = vpack.c.bf16 %v675_v6, %v672_v5  ;;  %v667_v13 = vadd.f32 %v3147_v4, %v666_v10  ;;  %v2376_v16 = vpack.c.bf16 %v931_v9, %v928_v8  ;;  %v923_v17 = vadd.f32 %v3147_v4, %v922_v14 }
  0xfc   : > { %v2649_v18 = vpop.f32.mrf.mxu0  ;;  %v2713_v20 = vpop.f32.mrf.mxu1 }
  0xfd   : > { %2504 = vst [vmem:[%s3159_s10 + $0x38] sm:$0xff] %v2216_v12   ;;  %v2211_v19 = vpack.c.bf16 %v667_v13, %v664_v11  ;;  %2536 = vst [vmem:[%s3159_s10 + $0x138] sm:$0xff] %v2376_v16   ;;  %v2371_v21 = vpack.c.bf16 %v923_v17, %v920_v15  ;;  %v688_v25 = vadd.f32 %v2649_v18, %v3147_v4 }
  0xfe   : > { %v679_v22 = vpop.f32.mrf.mxu0  ;;  %v935_v23 = vpop.f32.mrf.mxu1  ;;  %v944_v28 = vadd.f32 %v2713_v20, %v3147_v4 }
  0xff   : > { %2503 = vst [vmem:[%s3159_s10 + $0x30] sm:$0xff] %v2211_v19   ;;  %2535 = vst [vmem:[%s3159_s10 + $0x130] sm:$0xff] %v2371_v21   ;;  %v680_v31 = vadd.f32 %v3147_v4, %v679_v22  ;;  %v936_v35 = vadd.f32 %v3147_v4, %v935_v23 }
 0x100   : > { %v2650_v24 = vpop.f32.mrf.mxu0  ;;  %v2714_v27 = vpop.f32.mrf.mxu1 }
 0x101   : > { %v691_v26 = vadd.f32 %v2650_v24, %v3147_v4  ;;  %v947_v29 = vadd.f32 %v2714_v27, %v3147_v4 }
 0x102   : > { %v682_v30 = vpop.f32.mrf.mxu0  ;;  %v938_v34 = vpop.f32.mrf.mxu1 }
 0x103   : > { %v2226_v32 = vpack.c.bf16 %v691_v26, %v688_v25  ;;  %v683_v33 = vadd.f32 %v3147_v4, %v682_v30  ;;  %v2386_v36 = vpack.c.bf16 %v947_v29, %v944_v28  ;;  %v939_v37 = vadd.f32 %v3147_v4, %v938_v34 }
 0x104   : > { %v2653_v38 = vpop.f32.mrf.mxu0  ;;  %v2717_v40 = vpop.f32.mrf.mxu1 }
 0x105   : > { %2506 = vst [vmem:[%s3159_s10 + $0x48] sm:$0xff] %v2226_v32   ;;  %v2221_v39 = vpack.c.bf16 %v683_v33, %v680_v31  ;;  %2538 = vst [vmem:[%s3159_s10 + $0x148] sm:$0xff] %v2386_v36   ;;  %v2381_v41 = vpack.c.bf16 %v939_v37, %v936_v35  ;;  %v704_v45 = vadd.f32 %v2653_v38, %v3147_v4 }
 0x106   : > { %v695_v42 = vpop.f32.mrf.mxu0  ;;  %v951_v43 = vpop.f32.mrf.mxu1  ;;  %v960_v48 = vadd.f32 %v2717_v40, %v3147_v4 }
 0x107   : > { %2505 = vst [vmem:[%s3159_s10 + $0x40] sm:$0xff] %v2221_v39   ;;  %2537 = vst [vmem:[%s3159_s10 + $0x140] sm:$0xff] %v2381_v41   ;;  %v696_v51 = vadd.f32 %v3147_v4, %v695_v42  ;;  %v952_v55 = vadd.f32 %v3147_v4, %v951_v43 }
 0x108   : > { %v2654_v44 = vpop.f32.mrf.mxu0  ;;  %v2718_v47 = vpop.f32.mrf.mxu1 }
 0x109   : > { %v707_v46 = vadd.f32 %v2654_v44, %v3147_v4  ;;  %v963_v49 = vadd.f32 %v2718_v47, %v3147_v4 }
 0x10a   : > { %v698_v50 = vpop.f32.mrf.mxu0  ;;  %v954_v54 = vpop.f32.mrf.mxu1 }
 0x10b   : > { %v2236_v52 = vpack.c.bf16 %v707_v46, %v704_v45  ;;  %v699_v53 = vadd.f32 %v3147_v4, %v698_v50  ;;  %v2396_v56 = vpack.c.bf16 %v963_v49, %v960_v48  ;;  %v955_v57 = vadd.f32 %v3147_v4, %v954_v54 }
 0x10c   : > { %v2657_v58 = vpop.f32.mrf.mxu0  ;;  %v2721_v60 = vpop.f32.mrf.mxu1 }
 0x10d   : > { %2508 = vst [vmem:[%s3159_s10 + $0x58] sm:$0xff] %v2236_v52   ;;  %v2231_v59 = vpack.c.bf16 %v699_v53, %v696_v51  ;;  %2540 = vst [vmem:[%s3159_s10 + $0x158] sm:$0xff] %v2396_v56   ;;  %v2391_v61 = vpack.c.bf16 %v955_v57, %v952_v55  ;;  %v720_v1 = vadd.f32 %v2657_v58, %v3147_v4 }
 0x10e   : > { %v711_v62 = vpop.f32.mrf.mxu0  ;;  %v967_v63 = vpop.f32.mrf.mxu1  ;;  %v976_v5 = vadd.f32 %v2721_v60, %v3147_v4 }
 0x10f   : > { %2507 = vst [vmem:[%s3159_s10 + $0x50] sm:$0xff] %v2231_v59   ;;  %2539 = vst [vmem:[%s3159_s10 + $0x150] sm:$0xff] %v2391_v61   ;;  %v712_v8 = vadd.f32 %v3147_v4, %v711_v62  ;;  %v968_v12 = vadd.f32 %v3147_v4, %v967_v63 }
 0x110   : > { %v2658_v0 = vpop.f32.mrf.mxu0  ;;  %v2722_v3 = vpop.f32.mrf.mxu1 }
 0x111   : > { %v723_v2 = vadd.f32 %v2658_v0, %v3147_v4  ;;  %v979_v6 = vadd.f32 %v2722_v3, %v3147_v4 }
 0x112   : > { %v714_v7 = vpop.f32.mrf.mxu0  ;;  %v970_v11 = vpop.f32.mrf.mxu1 }
 0x113   : > { %v2246_v9 = vpack.c.bf16 %v723_v2, %v720_v1  ;;  %v715_v10 = vadd.f32 %v3147_v4, %v714_v7  ;;  %v2406_v13 = vpack.c.bf16 %v979_v6, %v976_v5  ;;  %v971_v14 = vadd.f32 %v3147_v4, %v970_v11 }
 0x114   : > { %v2661_v15 = vpop.f32.mrf.mxu0  ;;  %v2725_v17 = vpop.f32.mrf.mxu1 }
 0x115   : > { %2510 = vst [vmem:[%s3159_s10 + $0x68] sm:$0xff] %v2246_v9   ;;  %v2241_v16 = vpack.c.bf16 %v715_v10, %v712_v8  ;;  %2542 = vst [vmem:[%s3159_s10 + $0x168] sm:$0xff] %v2406_v13   ;;  %v2401_v18 = vpack.c.bf16 %v971_v14, %v968_v12  ;;  %v736_v22 = vadd.f32 %v2661_v15, %v3147_v4 }
 0x116   : > { %v727_v19 = vpop.f32.mrf.mxu0  ;;  %v983_v20 = vpop.f32.mrf.mxu1  ;;  %v992_v25 = vadd.f32 %v2725_v17, %v3147_v4 }
 0x117   : > { %2509 = vst [vmem:[%s3159_s10 + $0x60] sm:$0xff] %v2241_v16   ;;  %2541 = vst [vmem:[%s3159_s10 + $0x160] sm:$0xff] %v2401_v18   ;;  %v728_v28 = vadd.f32 %v3147_v4, %v727_v19  ;;  %v984_v32 = vadd.f32 %v3147_v4, %v983_v20 }
 0x118   : > { %v2662_v21 = vpop.f32.mrf.mxu0  ;;  %v2726_v24 = vpop.f32.mrf.mxu1 }
 0x119   : > { %v739_v23 = vadd.f32 %v2662_v21, %v3147_v4  ;;  %v995_v26 = vadd.f32 %v2726_v24, %v3147_v4 }
 0x11a   : > { %v730_v27 = vpop.f32.mrf.mxu0  ;;  %v986_v31 = vpop.f32.mrf.mxu1 }
 0x11b   : > { %v2256_v29 = vpack.c.bf16 %v739_v23, %v736_v22  ;;  %v731_v30 = vadd.f32 %v3147_v4, %v730_v27  ;;  %v2416_v33 = vpack.c.bf16 %v995_v26, %v992_v25  ;;  %v987_v34 = vadd.f32 %v3147_v4, %v986_v31 }
 0x11c   : > { %v2665_v35 = vpop.f32.mrf.mxu0  ;;  %v2729_v37 = vpop.f32.mrf.mxu1 }
 0x11d   : > { %2512 = vst [vmem:[%s3159_s10 + $0x78] sm:$0xff] %v2256_v29   ;;  %v2251_v36 = vpack.c.bf16 %v731_v30, %v728_v28  ;;  %2544 = vst [vmem:[%s3159_s10 + $0x178] sm:$0xff] %v2416_v33   ;;  %v2411_v38 = vpack.c.bf16 %v987_v34, %v984_v32  ;;  %v752_v42 = vadd.f32 %v2665_v35, %v3147_v4 }
 0x11e   : > { %v743_v39 = vpop.f32.mrf.mxu0  ;;  %v999_v40 = vpop.f32.mrf.mxu1  ;;  %v1008_v45 = vadd.f32 %v2729_v37, %v3147_v4 }
 0x11f   : > { %2511 = vst [vmem:[%s3159_s10 + $0x70] sm:$0xff] %v2251_v36   ;;  %2543 = vst [vmem:[%s3159_s10 + $0x170] sm:$0xff] %v2411_v38   ;;  %v744_v48 = vadd.f32 %v3147_v4, %v743_v39  ;;  %v1000_v52 = vadd.f32 %v3147_v4, %v999_v40 }
 0x120   : > { %v2666_v41 = vpop.f32.mrf.mxu0  ;;  %v2730_v44 = vpop.f32.mrf.mxu1 }
 0x121   : > { %v755_v43 = vadd.f32 %v2666_v41, %v3147_v4  ;;  %v1011_v46 = vadd.f32 %v2730_v44, %v3147_v4 }
 0x122   : > { %v746_v47 = vpop.f32.mrf.mxu0  ;;  %v1002_v51 = vpop.f32.mrf.mxu1 }
 0x123   : > { %v2266_v49 = vpack.c.bf16 %v755_v43, %v752_v42  ;;  %v747_v50 = vadd.f32 %v3147_v4, %v746_v47  ;;  %v2426_v53 = vpack.c.bf16 %v1011_v46, %v1008_v45  ;;  %v1003_v54 = vadd.f32 %v3147_v4, %v1002_v51 }
 0x124   : > { %v2669_v55 = vpop.f32.mrf.mxu0  ;;  %v2733_v57 = vpop.f32.mrf.mxu1 }
 0x125   : > { %2514 = vst [vmem:[%s3159_s10 + $0x88] sm:$0xff] %v2266_v49   ;;  %v2261_v56 = vpack.c.bf16 %v747_v50, %v744_v48  ;;  %2546 = vst [vmem:[%s3159_s10 + $0x188] sm:$0xff] %v2426_v53   ;;  %v2421_v58 = vpack.c.bf16 %v1003_v54, %v1000_v52  ;;  %v768_v62 = vadd.f32 %v2669_v55, %v3147_v4 }
 0x126   : > { %v759_v59 = vpop.f32.mrf.mxu0  ;;  %v1015_v60 = vpop.f32.mrf.mxu1  ;;  %v1024_v1 = vadd.f32 %v2733_v57, %v3147_v4 }
 0x127   : > { %2513 = vst [vmem:[%s3159_s10 + $0x80] sm:$0xff] %v2261_v56   ;;  %2545 = vst [vmem:[%s3159_s10 + $0x180] sm:$0xff] %v2421_v58   ;;  %v760_v5 = vadd.f32 %v3147_v4, %v759_v59  ;;  %v1016_v9 = vadd.f32 %v3147_v4, %v1015_v60 }
 0x128   : > { %v2670_v61 = vpop.f32.mrf.mxu0  ;;  %v2734_v0 = vpop.f32.mrf.mxu1 }
 0x129   : > { %v771_v63 = vadd.f32 %v2670_v61, %v3147_v4  ;;  %v1027_v2 = vadd.f32 %v2734_v0, %v3147_v4 }
 0x12a   : > { %v762_v3 = vpop.f32.mrf.mxu0  ;;  %v1018_v8 = vpop.f32.mrf.mxu1 }
 0x12b   : > { %v2276_v6 = vpack.c.bf16 %v771_v63, %v768_v62  ;;  %v763_v7 = vadd.f32 %v3147_v4, %v762_v3  ;;  %v2436_v10 = vpack.c.bf16 %v1027_v2, %v1024_v1  ;;  %v1019_v11 = vadd.f32 %v3147_v4, %v1018_v8 }
 0x12c   : > { %v2673_v12 = vpop.f32.mrf.mxu0  ;;  %v2737_v14 = vpop.f32.mrf.mxu1 }
 0x12d   : > { %2516 = vst [vmem:[%s3159_s10 + $0x98] sm:$0xff] %v2276_v6   ;;  %v2271_v13 = vpack.c.bf16 %v763_v7, %v760_v5  ;;  %2548 = vst [vmem:[%s3159_s10 + $0x198] sm:$0xff] %v2436_v10   ;;  %v2431_v15 = vpack.c.bf16 %v1019_v11, %v1016_v9  ;;  %v784_v19 = vadd.f32 %v2673_v12, %v3147_v4 }
 0x12e   : > { %v775_v16 = vpop.f32.mrf.mxu0  ;;  %v1031_v17 = vpop.f32.mrf.mxu1  ;;  %v1040_v22 = vadd.f32 %v2737_v14, %v3147_v4 }
 0x12f   : > { %2515 = vst [vmem:[%s3159_s10 + $0x90] sm:$0xff] %v2271_v13   ;;  %2547 = vst [vmem:[%s3159_s10 + $0x190] sm:$0xff] %v2431_v15   ;;  %v776_v25 = vadd.f32 %v3147_v4, %v775_v16  ;;  %v1032_v29 = vadd.f32 %v3147_v4, %v1031_v17 }
 0x130   : > { %v2674_v18 = vpop.f32.mrf.mxu0  ;;  %v2738_v21 = vpop.f32.mrf.mxu1 }
 0x131   : > { %v787_v20 = vadd.f32 %v2674_v18, %v3147_v4  ;;  %v1043_v23 = vadd.f32 %v2738_v21, %v3147_v4 }
 0x132   : > { %v778_v24 = vpop.f32.mrf.mxu0  ;;  %v1034_v28 = vpop.f32.mrf.mxu1 }
 0x133   : > { %v2286_v26 = vpack.c.bf16 %v787_v20, %v784_v19  ;;  %v779_v27 = vadd.f32 %v3147_v4, %v778_v24  ;;  %v2446_v30 = vpack.c.bf16 %v1043_v23, %v1040_v22  ;;  %v1035_v31 = vadd.f32 %v3147_v4, %v1034_v28 }
 0x134   : > { %v2677_v32 = vpop.f32.mrf.mxu0  ;;  %v2741_v34 = vpop.f32.mrf.mxu1 }
 0x135   : > { %2518 = vst [vmem:[%s3159_s10 + $0xa8] sm:$0xff] %v2286_v26   ;;  %v2281_v33 = vpack.c.bf16 %v779_v27, %v776_v25  ;;  %2550 = vst [vmem:[%s3159_s10 + $0x1a8] sm:$0xff] %v2446_v30   ;;  %v2441_v35 = vpack.c.bf16 %v1035_v31, %v1032_v29  ;;  %v800_v39 = vadd.f32 %v2677_v32, %v3147_v4 }
 0x136   : > { %v791_v36 = vpop.f32.mrf.mxu0  ;;  %v1047_v37 = vpop.f32.mrf.mxu1  ;;  %v1056_v42 = vadd.f32 %v2741_v34, %v3147_v4 }
 0x137   : > { %2517 = vst [vmem:[%s3159_s10 + $0xa0] sm:$0xff] %v2281_v33   ;;  %2549 = vst [vmem:[%s3159_s10 + $0x1a0] sm:$0xff] %v2441_v35   ;;  %v792_v45 = vadd.f32 %v3147_v4, %v791_v36  ;;  %v1048_v49 = vadd.f32 %v3147_v4, %v1047_v37 }
 0x138   : > { %v2678_v38 = vpop.f32.mrf.mxu0  ;;  %v2742_v41 = vpop.f32.mrf.mxu1 }
 0x139   : > { %v803_v40 = vadd.f32 %v2678_v38, %v3147_v4  ;;  %v1059_v43 = vadd.f32 %v2742_v41, %v3147_v4 }
 0x13a   : > { %v794_v44 = vpop.f32.mrf.mxu0  ;;  %v1050_v48 = vpop.f32.mrf.mxu1 }
 0x13b   : > { %v2296_v46 = vpack.c.bf16 %v803_v40, %v800_v39  ;;  %v795_v47 = vadd.f32 %v3147_v4, %v794_v44  ;;  %v2456_v50 = vpack.c.bf16 %v1059_v43, %v1056_v42  ;;  %v1051_v51 = vadd.f32 %v3147_v4, %v1050_v48 }
 0x13c   : > { %v2681_v52 = vpop.f32.mrf.mxu0  ;;  %v2745_v54 = vpop.f32.mrf.mxu1 }
 0x13d   : > { %2520 = vst [vmem:[%s3159_s10 + $0xb8] sm:$0xff] %v2296_v46   ;;  %v2291_v53 = vpack.c.bf16 %v795_v47, %v792_v45  ;;  %2552 = vst [vmem:[%s3159_s10 + $0x1b8] sm:$0xff] %v2456_v50   ;;  %v2451_v55 = vpack.c.bf16 %v1051_v51, %v1048_v49  ;;  %v816_v59 = vadd.f32 %v2681_v52, %v3147_v4 }
 0x13e   : > { %v807_v56 = vpop.f32.mrf.mxu0  ;;  %v1063_v57 = vpop.f32.mrf.mxu1  ;;  %v1072_v62 = vadd.f32 %v2745_v54, %v3147_v4 }
 0x13f   : > { %2519 = vst [vmem:[%s3159_s10 + $0xb0] sm:$0xff] %v2291_v53   ;;  %2551 = vst [vmem:[%s3159_s10 + $0x1b0] sm:$0xff] %v2451_v55   ;;  %v808_v1 = vadd.f32 %v3147_v4, %v807_v56  ;;  %v1064_v6 = vadd.f32 %v3147_v4, %v1063_v57 }
 0x140   : > { %v2682_v58 = vpop.f32.mrf.mxu0  ;;  %v2746_v61 = vpop.f32.mrf.mxu1 }
 0x141   : > { %v819_v60 = vadd.f32 %v2682_v58, %v3147_v4  ;;  %v1075_v63 = vadd.f32 %v2746_v61, %v3147_v4 }
 0x142   : > { %v810_v0 = vpop.f32.mrf.mxu0  ;;  %v1066_v5 = vpop.f32.mrf.mxu1 }
 0x143   : > { %v2306_v2 = vpack.c.bf16 %v819_v60, %v816_v59  ;;  %v811_v3 = vadd.f32 %v3147_v4, %v810_v0  ;;  %v2466_v7 = vpack.c.bf16 %v1075_v63, %v1072_v62  ;;  %v1067_v8 = vadd.f32 %v3147_v4, %v1066_v5 }
 0x144   : > { %v2685_v9 = vpop.f32.mrf.mxu0  ;;  %v2749_v11 = vpop.f32.mrf.mxu1 }
 0x145   : > { %2522 = vst [vmem:[%s3159_s10 + $0xc8] sm:$0xff] %v2306_v2   ;;  %v2301_v10 = vpack.c.bf16 %v811_v3, %v808_v1  ;;  %2554 = vst [vmem:[%s3159_s10 + $0x1c8] sm:$0xff] %v2466_v7   ;;  %v2461_v12 = vpack.c.bf16 %v1067_v8, %v1064_v6  ;;  %v832_v16 = vadd.f32 %v2685_v9, %v3147_v4 }
 0x146   : > { %v823_v13 = vpop.f32.mrf.mxu0  ;;  %v1079_v14 = vpop.f32.mrf.mxu1  ;;  %v1088_v19 = vadd.f32 %v2749_v11, %v3147_v4 }
 0x147   : > { %2521 = vst [vmem:[%s3159_s10 + $0xc0] sm:$0xff] %v2301_v10   ;;  %2553 = vst [vmem:[%s3159_s10 + $0x1c0] sm:$0xff] %v2461_v12   ;;  %v824_v22 = vadd.f32 %v3147_v4, %v823_v13  ;;  %v1080_v26 = vadd.f32 %v3147_v4, %v1079_v14 }
 0x148   : > { %v2686_v15 = vpop.f32.mrf.mxu0  ;;  %v2750_v18 = vpop.f32.mrf.mxu1 }
 0x149   : > { %v835_v17 = vadd.f32 %v2686_v15, %v3147_v4  ;;  %v1091_v20 = vadd.f32 %v2750_v18, %v3147_v4 }
 0x14a   : > { %v826_v21 = vpop.f32.mrf.mxu0  ;;  %v1082_v25 = vpop.f32.mrf.mxu1 }
 0x14b   : > { %v2316_v23 = vpack.c.bf16 %v835_v17, %v832_v16  ;;  %v827_v24 = vadd.f32 %v3147_v4, %v826_v21  ;;  %v2476_v27 = vpack.c.bf16 %v1091_v20, %v1088_v19  ;;  %v1083_v28 = vadd.f32 %v3147_v4, %v1082_v25 }
 0x14c   : > { %v2689_v29 = vpop.f32.mrf.mxu0  ;;  %v2753_v31 = vpop.f32.mrf.mxu1 }
 0x14d   : > { %2524 = vst [vmem:[%s3159_s10 + $0xd8] sm:$0xff] %v2316_v23   ;;  %v2311_v30 = vpack.c.bf16 %v827_v24, %v824_v22  ;;  %2556 = vst [vmem:[%s3159_s10 + $0x1d8] sm:$0xff] %v2476_v27   ;;  %v2471_v32 = vpack.c.bf16 %v1083_v28, %v1080_v26  ;;  %v848_v36 = vadd.f32 %v2689_v29, %v3147_v4 }
 0x14e   : > { %v839_v33 = vpop.f32.mrf.mxu0  ;;  %v1095_v34 = vpop.f32.mrf.mxu1  ;;  %v1104_v39 = vadd.f32 %v2753_v31, %v3147_v4 }
 0x14f   : > { %2523 = vst [vmem:[%s3159_s10 + $0xd0] sm:$0xff] %v2311_v30   ;;  %2555 = vst [vmem:[%s3159_s10 + $0x1d0] sm:$0xff] %v2471_v32   ;;  %v840_v42 = vadd.f32 %v3147_v4, %v839_v33  ;;  %v1096_v46 = vadd.f32 %v3147_v4, %v1095_v34 }
 0x150   : > { %v2690_v35 = vpop.f32.mrf.mxu0  ;;  %v2754_v38 = vpop.f32.mrf.mxu1 }
 0x151   : > { %v851_v37 = vadd.f32 %v2690_v35, %v3147_v4  ;;  %v1107_v40 = vadd.f32 %v2754_v38, %v3147_v4 }
 0x152   : > { %v842_v41 = vpop.f32.mrf.mxu0  ;;  %v1098_v45 = vpop.f32.mrf.mxu1 }
 0x153   : > { %v2326_v43 = vpack.c.bf16 %v851_v37, %v848_v36  ;;  %v843_v44 = vadd.f32 %v3147_v4, %v842_v41  ;;  %v2486_v47 = vpack.c.bf16 %v1107_v40, %v1104_v39  ;;  %v1099_v48 = vadd.f32 %v3147_v4, %v1098_v45 }
 0x154   : > { %v2693_v49 = vpop.f32.mrf.mxu0  ;;  %v2757_v51 = vpop.f32.mrf.mxu1 }
 0x155   : > { %2526 = vst [vmem:[%s3159_s10 + $0xe8] sm:$0xff] %v2326_v43   ;;  %v2321_v50 = vpack.c.bf16 %v843_v44, %v840_v42  ;;  %2558 = vst [vmem:[%s3159_s10 + $0x1e8] sm:$0xff] %v2486_v47   ;;  %v2481_v52 = vpack.c.bf16 %v1099_v48, %v1096_v46  ;;  %v864_v56 = vadd.f32 %v2693_v49, %v3147_v4 }
 0x156   : > { %v855_v53 = vpop.f32.mrf.mxu0  ;;  %v1111_v54 = vpop.f32.mrf.mxu1  ;;  %v1120_v59 = vadd.f32 %v2757_v51, %v3147_v4 }
 0x157   : > { %2525 = vst [vmem:[%s3159_s10 + $0xe0] sm:$0xff] %v2321_v50   ;;  %2557 = vst [vmem:[%s3159_s10 + $0x1e0] sm:$0xff] %v2481_v52   ;;  %v856_v62 = vadd.f32 %v3147_v4, %v855_v53  ;;  %v1112_v2 = vadd.f32 %v3147_v4, %v1111_v54 }
 0x158   : > { %v2694_v55 = vpop.f32.mrf.mxu0  ;;  %v2758_v58 = vpop.f32.mrf.mxu1 }
 0x159   : > { %v867_v57 = vadd.f32 %v2694_v55, %v3147_v4  ;;  %v1123_v60 = vadd.f32 %v2758_v58, %v3147_v4 }
 0x15a   : > { %v858_v61 = vpop.f32.mrf.mxu0  ;;  %v1114_v1 = vpop.f32.mrf.mxu1 }
 0x15b   : > { %v2336_v63 = vpack.c.bf16 %v867_v57, %v864_v56  ;;  %v859_v0 = vadd.f32 %v3147_v4, %v858_v61  ;;  %v2496_v3 = vpack.c.bf16 %v1123_v60, %v1120_v59  ;;  %v1115_v5 = vadd.f32 %v3147_v4, %v1114_v1 }
 0x15d   : > { %2528 = vst [vmem:[%s3159_s10 + $0xf8] sm:$0xff] %v2336_v63   ;;  %v2331_v6 = vpack.c.bf16 %v859_v0, %v856_v62  ;;  %2560 = vst [vmem:[%s3159_s10 + $0x1f8] sm:$0xff] %v2496_v3   ;;  %v2491_v7 = vpack.c.bf16 %v1115_v5, %v1112_v2 }
 0x15f   : > { %2527 = vst [vmem:[%s3159_s10 + $0xf0] sm:$0xff] %v2331_v6   ;;  %2559 = vst [vmem:[%s3159_s10 + $0x1f0] sm:$0xff] %v2491_v7  }
 0x160   : > { %2819 = shalt.err (!%p2816_p3)
}
 0x161   : > { %s2820_s29 = scalar_lea.hbm %s3347_s16, 8192  ;;  %s2824_s5 = scalar_lea.hbm %s3399_s3, 16384 }
 0x162   : > { %p2821_p4 = scmp.ne.s32.totalorder %s3347_s16, %s2820_s29  ;;  %p2825_p9 = scmp.lt.s32.totalorder %s3347_s16, %s3399_s3 }
 0x163   : > { %p2826_p10 = scmp.lt.s32.totalorder %s2824_s5, %s2820_s29 }
 0x164   : > { %p2822_p7 = pnand %p2821_p4, %p2929_p5 }
 0x165   : > { %p2827_p11 = por %p2826_p10, %p2825_p9 }
 0x166   : > { %p2823_p8 = pneg %p2822_p7 }
 0x168   : > { %p2828_p12 = pnand %p2827_p11, %p2823_p8 }
 0x16a   : > { %2831 = shalt.err (!%p2828_p12)
}
 0x16b   : > { %s2869_s8 = smov 64   ;;  %s2870_s9 = smov 4  }
 0x16c   : > { %2763 = dma.vmem_to_hbm [thread:$0]  (%p2929_p5), %s3349_s17, 8192, %s3347_s16, %s3356_s24, %s2869_s8, %s2869_s8, %s2870_s9  }
 0x16d PF: > { %p2769_p13 = scmp.ge.s32.totalorder %s2866_s15, 2  ;;  %s1795_s10 = sand.u32 1, %s2854_s12  }
 0x16e   : > { %s1796_s11 = scalar_lea.sflag [#allocation3], %s1795_s10 }
 0x16f   : > { %p2766_p0 = pnand %p2769_p13, %p2933_p6 }
 0x171   : > { %p2767_p1 = pneg %p2766_p0 }
 0x173   : > { %2849 = dma.done.wait (%p2767_p1), %s1796_s11, 8192  }
 0x174   : > { %2851 = vsyncadd (%p2767_p1), %s1796_s11, 4294959104  ;;  %p13_p2 = scmp.ge.s32.totalorder %s2916_s18, 4   ;;  %s3402_s12 = smov %s2858_s13 }
 0x175   : > { %s3403_s13 = smov %s2862_s14  ;;  %s3404_s14 = smov %s2927_s21 }
 0x176   : > { %s3405_s15 = smov %s2916_s18  ;;  %15 = sbr.rel (!%p13_p2) target bundleno = 3 (0x3), region = 67 }
 0x17b   :  { %1801 = vsyncpa [#allocation3], 1 }
 0x17c   :  { %1803 = vsyncpa [#allocation3 + $0x1], 1 }

// kernel: tpu_custom_call.1
= control target key start
LH: loop header
LB: loop body
LE: loop exit
PB: predicated region body
PF: predicated region fallthrough
CT: control target
= control target key end

     0   :  { %8 = vsyncpa [#allocation3], 0  ;;  %s3396_s0 = inlined_call_operand.vmem [shape: f32[2048,32], index: 0, kind: input, shape index: {}]   ;;  %s3397_s1 = inlined_call_operand.vmem [shape: bf16[32,128], index: 1, kind: input, shape index: {}]   ;;  %s3398_s2 = inlined_call_operand.vmem [shape: f32[1,128], index: 2, kind: input, shape index: {}]   ;;  %s3399_s3 = inlined_call_operand.hbm [shape: bf16[2048,128], index: 3, kind: output, shape index: {}]  }
   0x1   :  { %10 = vsyncpa [#allocation3 + $0x1], 0  ;;  %s2891_s12 = smov 0   ;;  %s2893_s13 = smov 0  }
   0x2   :  { %s2895_s14 = smov 0   ;;  %s2897_s15 = smov 0  }
   0x3 LB: > { %s2912_s16 = sadd.s32 4294967295, %s2866_s15   ;;  %s1842_s17 = sadd.s32 4294967294, %s2866_s15   ;;  %s2866_s15 = sphi %s2897_s15, %s3405_s15   ;;  %s2862_s14 = sphi %s2895_s14, %s3404_s14   ;;  %s2858_s13 = sphi %s2893_s13, %s3403_s13   ;;  %s2854_s12 = sphi %s2891_s12, %s3402_s12  }
   0x4   : > { %s2916_s18 = sadd.s32 1, %s2866_s15   ;;  %s91_s19 = sadd.s32 1, %s2862_s14 }
   0x5   : > { %s88_s20 = ssub.s32 %s2866_s15, %s2916_s18  ;;  %p101_p0 = scmp.ne.s32.totalorder %s2862_s14, %s2858_s13 }
   0x6   : > { %p89_p1 = scmp.eq.s32.totalorder %s88_s20, 0  ;;  %p102_p2 = scmp.eq.s32.totalorder %s2912_s16, 1 }
   0x7   : > { %p107_p3 = scmp.ne.s32.totalorder %s2858_s13, %s2854_s12  ;;  %p108_p4 = scmp.eq.s32.totalorder %s1842_s17, 1 }
   0x8   : > { %s2927_s21 = scalar_select %p89_p1, %s2862_s14, %s91_s19  }
   0x9   : > { %p2929_p5 = por %p102_p2, %p101_p0  ;;  %p2933_p6 = por %p108_p4, %p107_p3 }
   0xa   : > { %p1845_p7 = scmp.ge.s32.totalorder %s2866_s15, 1  ;;  %p141_p8 = scmp.lt.s32.totalorder %s2866_s15, 3 }
   0xc   : > { %p142_p9 = pnand %p1845_p7, %p141_p8 }
   0xd   : > { %s1847_s26 = sshll.u32 (!%p142_p9), %s2912_s16, 7  ;;  %s162_s6 = sand.u32 (!%p142_p9), 1, %s2858_s13  }
   0xe   : > { %145 = sbr.rel (%p142_p9) target bundleno = 365 (0x16d), region = 32  ;;  %p166_p10 = scmp.lt.s32.totalorder (!%p142_p9), %s1847_s26, 255 }
   0xf   : > { %s1846_s9 = sshll.u32 (!%p142_p9), %s162_s6, 9  ;;  %s2177_s11 = sshll.u32 (!%p142_p9), %s2912_s16, 13 }
  0x10   : > { %s3159_s10 = scalar_lea.vmem (!%p142_p9), [#allocation2], %s1846_s9  ;;  %s3347_s16 = scalar_lea.hbm (!%p142_p9), %s3399_s3, %s2177_s11 }
  0x11   : > { %s1780_s17 = sshll.u32 (!%p142_p9), %s3159_s10, 4  ;;  %s3356_s24 = scalar_lea.sflag (!%p142_p9), [#allocation3], %s162_s6  ;;  %s3349_s17 = int_to_ptr.vmem [resolvable:$true] %s1780_s17 }
  0x12   : > { %s2806_s25 = scalar_lea.vmem (!%p142_p9), %s3349_s17, 8192 }
  0x13   : > { %v2804_v0 = vld [vmem:[%s3397_s1 + $0x8] sm:$0xff]   ;;  %v2805_v1 = vld [vmem:[%s3397_s1] sm:$0xff]   ;;  %s3407_s26 = smov (!%p166_p10, %s1847_s26), 255  ;;  %vm388_vm0 = vcmask 261120   ;;  %p2807_p11 = scmp.ne.s32.totalorder %s3349_s17, %s2806_s25 }
  0x14   : > { %2627 = vmatprep.subr.bf16.mxu0 %v2804_v0  ;;  %2759 = vmatprep.subr.bf16.mxu1 %v2804_v0  ;;  %s1848_s29 = sshll.u32 %s3407_s26, 3  ;;  %s2868_s26 = smov [#allocation2]  }
  0x15   : > { %2628 = vmatpush3.bf16.msra.mxu0 %v2804_v0  ;;  %2761 = vmatpush3.bf16.msra.mxu1 %v2804_v0  ;;  %s2949_s5 = scalar_lea.vmem %s3396_s0, %s1848_s29  ;;  %p2808_p12 = pnand %p2807_p11, %p2929_p5 }
  0x16   : > { %2629 = vmatprep.subr.bf16.mxu0 %v2805_v1  ;;  %2760 = vmatprep.subr.bf16.mxu1 %v2805_v1  ;;  %v173_v2 = vld [vmem:[%s2949_s5] sm:$0xff]  ;;  %v174_v3 = vld [vmem:[%s2949_s5 + $0x8] sm:$0xff]  ;;  %v175_v7 = vld [vmem:[%s2949_s5 + $0x10] sm:$0xff]  ;;  %s2810_s27 = sshll.u32 %s2868_s26, 4  ;;  %s2811_s27 = int_to_ptr.vmem [resolvable:$false] %s2810_s27 }
  0x17   : > { %v237_v4 = vld [vmem:[%s2949_s5 + $0x200] sm:$0xff]  ;;  %v301_v5 = vpack.c.bf16 %v174_v3, %v173_v2  ;;  %v238_v6 = vld [vmem:[%s2949_s5 + $0x208] sm:$0xff]  ;;  %v176_v8 = vld [vmem:[%s2949_s5 + $0x18] sm:$0xff]  ;;  %p2809_p13 = pneg %p2808_p12  ;;  %s2812_s28 = scalar_lea.vmem %s2811_s27, 16384 }
  0x18   : > { %v333_v9 = vpack.c.bf16 %v238_v6, %v237_v4  ;;  %v302_v10 = vpack.c.bf16 %v176_v8, %v175_v7  ;;  %v239_v11 = vld [vmem:[%s2949_s5 + $0x210] sm:$0xff]  ;;  %v240_v12 = vld [vmem:[%s2949_s5 + $0x218] sm:$0xff]  ;;  %v177_v13 = vld [vmem:[%s2949_s5 + $0x20] sm:$0xff]  ;;  %p2813_p0 = scmp.lt.s32.totalorder %s3349_s17, %s2811_s27  ;;  %p2814_p1 = scmp.lt.s32.totalorder %s2812_s28, %s2806_s25 }
  0x19   : > { %2630 = vmatpush3.bf16.msra.mxu0 %v2805_v1  ;;  %2762 = vmatpush3.bf16.msra.mxu1 %v2805_v1  ;;  %v334_v14 = vpack.c.bf16 %v240_v12, %v239_v11  ;;  %v178_v15 = vld [vmem:[%s2949_s5 + $0x28] sm:$0xff]  ;;  %v241_v16 = vld [vmem:[%s2949_s5 + $0x220] sm:$0xff]  ;;  %v179_v20 = vld [vmem:[%s2949_s5 + $0x30] sm:$0xff] }
  0x1a   : > { %2631 = vmatprep.mubr.msk.bf16.mxu0 %vm388_vm0, %v301_v5  ;;  %v242_v17 = vld [vmem:[%s2949_s5 + $0x228] sm:$0xff]  ;;  %2695 = vmatprep.mubr.msk.bf16.mxu1 %vm388_vm0, %v333_v9  ;;  %v303_v18 = vpack.c.bf16 %v178_v15, %v177_v13  ;;  %v180_v21 = vld [vmem:[%s2949_s5 + $0x38] sm:$0xff]  ;;  %v243_v22 = vld [vmem:[%s2949_s5 + $0x230] sm:$0xff]  ;;  %p2815_p2 = por %p2814_p1, %p2813_p0 }
  0x1b   : > { %v335_v19 = vpack.c.bf16 %v242_v17, %v241_v16  ;;  %v244_v23 = vld [vmem:[%s2949_s5 + $0x238] sm:$0xff]  ;;  %v181_v24 = vld [vmem:[%s2949_s5 + $0x40] sm:$0xff]  ;;  %v182_v25 = vld [vmem:[%s2949_s5 + $0x48] sm:$0xff]  ;;  %v304_v28 = vpack.c.bf16 %v180_v21, %v179_v20 }
  0x1c   : > { %2632 = vmatmul.mubr.msk.bf16.vlgmr.msra.gmra.mxu0 %vm388_vm0, %v302_v10  ;;  %2696 = vmatmul.mubr.msk.bf16.vlgmr.msra.gmra.mxu1 %vm388_vm0, %v334_v14  ;;  %v245_v26 = vld [vmem:[%s2949_s5 + $0x240] sm:$0xff]  ;;  %v246_v27 = vld [vmem:[%s2949_s5 + $0x248] sm:$0xff]  ;;  %v336_v29 = vpack.c.bf16 %v244_v23, %v243_v22  ;;  %v305_v30 = vpack.c.bf16 %v182_v25, %v181_v24  ;;  %v183_v32 = vld [vmem:[%s2949_s5 + $0x50] sm:$0xff]  ;;  %p2816_p3 = pnand %p2815_p2, %p2809_p13 }
  0x1d   : > { %2635 = vmatprep.mubr.msk.bf16.mxu0 %vm388_vm0, %v303_v18  ;;  %2699 = vmatprep.mubr.msk.bf16.mxu1 %vm388_vm0, %v335_v19  ;;  %v337_v31 = vpack.c.bf16 %v246_v27, %v245_v26  ;;  %v184_v33 = vld [vmem:[%s2949_s5 + $0x58] sm:$0xff]  ;;  %v247_v34 = vld [vmem:[%s2949_s5 + $0x250] sm:$0xff]  ;;  %v185_v36 = vld [vmem:[%s2949_s5 + $0x60] sm:$0xff] }
  0x1e   : > { %v248_v35 = vld [vmem:[%s2949_s5 + $0x258] sm:$0xff]  ;;  %v186_v37 = vld [vmem:[%s2949_s5 + $0x68] sm:$0xff]  ;;  %v249_v38 = vld [vmem:[%s2949_s5 + $0x260] sm:$0xff]  ;;  %v306_v40 = vpack.c.bf16 %v184_v33, %v183_v32 }
  0x1f   : > { %v250_v39 = vld [vmem:[%s2949_s5 + $0x268] sm:$0xff]  ;;  %v338_v41 = vpack.c.bf16 %v248_v35, %v247_v34  ;;  %v307_v42 = vpack.c.bf16 %v186_v37, %v185_v36  ;;  %v187_v44 = vld [vmem:[%s2949_s5 + $0x70] sm:$0xff]  ;;  %v188_v45 = vld [vmem:[%s2949_s5 + $0x78] sm:$0xff] }
  0x20   : > { %v339_v43 = vpack.c.bf16 %v250_v39, %v249_v38  ;;  %v251_v46 = vld [vmem:[%s2949_s5 + $0x270] sm:$0xff]  ;;  %v252_v47 = vld [vmem:[%s2949_s5 + $0x278] sm:$0xff]  ;;  %v189_v48 = vld [vmem:[%s2949_s5 + $0x80] sm:$0xff]  ;;  %v308_v52 = vpack.c.bf16 %v188_v45, %v187_v44 }
  0x21   : > { %v190_v49 = vld [vmem:[%s2949_s5 + $0x88] sm:$0xff]  ;;  %v253_v50 = vld [vmem:[%s2949_s5 + $0x280] sm:$0xff]  ;;  %v340_v53 = vpack.c.bf16 %v252_v47, %v251_v46  ;;  %v191_v56 = vld [vmem:[%s2949_s5 + $0x90] sm:$0xff] }
  0x22   : > { %v254_v51 = vld [vmem:[%s2949_s5 + $0x288] sm:$0xff]  ;;  %v309_v54 = vpack.c.bf16 %v190_v49, %v189_v48  ;;  %v192_v57 = vld [vmem:[%s2949_s5 + $0x98] sm:$0xff]  ;;  %v255_v58 = vld [vmem:[%s2949_s5 + $0x290] sm:$0xff] }
  0x23   : > { %v341_v55 = vpack.c.bf16 %v254_v51, %v253_v50  ;;  %v256_v59 = vld [vmem:[%s2949_s5 + $0x298] sm:$0xff]  ;;  %v193_v60 = vld [vmem:[%s2949_s5 + $0xa0] sm:$0xff]  ;;  %v194_v61 = vld [vmem:[%s2949_s5 + $0xa8] sm:$0xff]  ;;  %v310_v0 = vpack.c.bf16 %v192_v57, %v191_v56 }
  0x24   : > { %2636 = vmatmul.mubr.msk.bf16.gmra.mxu0 %vm388_vm0, %v304_v28  ;;  %2700 = vmatmul.mubr.msk.bf16.gmra.mxu1 %vm388_vm0, %v336_v29  ;;  %v257_v62 = vld [vmem:[%s2949_s5 + $0x2a0] sm:$0xff]  ;;  %v258_v63 = vld [vmem:[%s2949_s5 + $0x2a8] sm:$0xff]  ;;  %v342_v1 = vpack.c.bf16 %v256_v59, %v255_v58  ;;  %v311_v2 = vpack.c.bf16 %v194_v61, %v193_v60  ;;  %v195_v4 = vld [vmem:[%s2949_s5 + $0xb0] sm:$0xff] }
  0x25   : > { %2639 = vmatprep.mubr.msk.bf16.mxu0 %vm388_vm0, %v305_v30  ;;  %2703 = vmatprep.mubr.msk.bf16.mxu1 %vm388_vm0, %v337_v31  ;;  %v343_v3 = vpack.c.bf16 %v258_v63, %v257_v62  ;;  %v196_v5 = vld [vmem:[%s2949_s5 + $0xb8] sm:$0xff]  ;;  %v259_v6 = vld [vmem:[%s2949_s5 + $0x2b0] sm:$0xff]  ;;  %v197_v8 = vld [vmem:[%s2949_s5 + $0xc0] sm:$0xff] }
  0x26   : > { %v260_v7 = vld [vmem:[%s2949_s5 + $0x2b8] sm:$0xff]  ;;  %v198_v9 = vld [vmem:[%s2949_s5 + $0xc8] sm:$0xff]  ;;  %v261_v10 = vld [vmem:[%s2949_s5 + $0x2c0] sm:$0xff]  ;;  %v312_v12 = vpack.c.bf16 %v196_v5, %v195_v4 }
  0x27   : > { %v262_v11 = vld [vmem:[%s2949_s5 + $0x2c8] sm:$0xff]  ;;  %v344_v13 = vpack.c.bf16 %v260_v7, %v259_v6  ;;  %v313_v14 = vpack.c.bf16 %v198_v9, %v197_v8  ;;  %v199_v16 = vld [vmem:[%s2949_s5 + $0xd0] sm:$0xff]  ;;  %v200_v17 = vld [vmem:[%s2949_s5 + $0xd8] sm:$0xff] }
  0x28   : > { %v345_v15 = vpack.c.bf16 %v262_v11, %v261_v10  ;;  %v263_v18 = vld [vmem:[%s2949_s5 + $0x2d0] sm:$0xff]  ;;  %v264_v19 = vld [vmem:[%s2949_s5 + $0x2d8] sm:$0xff]  ;;  %v201_v20 = vld [vmem:[%s2949_s5 + $0xe0] sm:$0xff]  ;;  %v314_v24 = vpack.c.bf16 %v200_v17, %v199_v16 }
  0x29   : > { %v202_v21 = vld [vmem:[%s2949_s5 + $0xe8] sm:$0xff]  ;;  %v265_v22 = vld [vmem:[%s2949_s5 + $0x2e0] sm:$0xff]  ;;  %v346_v25 = vpack.c.bf16 %v264_v19, %v263_v18  ;;  %v203_v28 = vld [vmem:[%s2949_s5 + $0xf0] sm:$0xff] }
  0x2a   : > { %v266_v23 = vld [vmem:[%s2949_s5 + $0x2e8] sm:$0xff]  ;;  %v315_v26 = vpack.c.bf16 %v202_v21, %v201_v20  ;;  %v204_v29 = vld [vmem:[%s2949_s5 + $0xf8] sm:$0xff]  ;;  %v267_v30 = vld [vmem:[%s2949_s5 + $0x2f0] sm:$0xff] }
  0x2b   : > { %v347_v27 = vpack.c.bf16 %v266_v23, %v265_v22  ;;  %v268_v31 = vld [vmem:[%s2949_s5 + $0x2f8] sm:$0xff]  ;;  %v205_v32 = vld [vmem:[%s2949_s5 + $0x100] sm:$0xff]  ;;  %v206_v33 = vld [vmem:[%s2949_s5 + $0x108] sm:$0xff]  ;;  %v316_v36 = vpack.c.bf16 %v204_v29, %v203_v28 }
  0x2c   : > { %2640 = vmatmul.mubr.msk.bf16.gmra.mxu0 %vm388_vm0, %v306_v40  ;;  %2704 = vmatmul.mubr.msk.bf16.gmra.mxu1 %vm388_vm0, %v338_v41  ;;  %v269_v34 = vld [vmem:[%s2949_s5 + $0x300] sm:$0xff]  ;;  %v270_v35 = vld [vmem:[%s2949_s5 + $0x308] sm:$0xff]  ;;  %v348_v37 = vpack.c.bf16 %v268_v31, %v267_v30  ;;  %v317_v38 = vpack.c.bf16 %v206_v33, %v205_v32  ;;  %v207_v40 = vld [vmem:[%s2949_s5 + $0x110] sm:$0xff] }
  0x2d   : > { %2643 = vmatprep.mubr.msk.bf16.mxu0 %vm388_vm0, %v307_v42  ;;  %2707 = vmatprep.mubr.msk.bf16.mxu1 %vm388_vm0, %v339_v43  ;;  %v349_v39 = vpack.c.bf16 %v270_v35, %v269_v34  ;;  %v208_v41 = vld [vmem:[%s2949_s5 + $0x118] sm:$0xff]  ;;  %v271_v42 = vld [vmem:[%s2949_s5 + $0x310] sm:$0xff]  ;;  %v209_v44 = vld [vmem:[%s2949_s5 + $0x120] sm:$0xff] }
  0x2e   : > { %v272_v43 = vld [vmem:[%s2949_s5 + $0x318] sm:$0xff]  ;;  %v210_v45 = vld [vmem:[%s2949_s5 + $0x128] sm:$0xff]  ;;  %v273_v46 = vld [vmem:[%s2949_s5 + $0x320] sm:$0xff]  ;;  %v318_v48 = vpack.c.bf16 %v208_v41, %v207_v40 }
  0x2f   : > { %v274_v47 = vld [vmem:[%s2949_s5 + $0x328] sm:$0xff]  ;;  %v350_v49 = vpack.c.bf16 %v272_v43, %v271_v42  ;;  %v319_v50 = vpack.c.bf16 %v210_v45, %v209_v44  ;;  %v213_v56 = vld [vmem:[%s2949_s5 + $0x140] sm:$0xff] }
  0x30   : > { %v351_v51 = vpack.c.bf16 %v274_v47, %v273_v46  ;;  %v214_v57 = vld [vmem:[%s2949_s5 + $0x148] sm:$0xff]  ;;  %v277_v58 = vld [vmem:[%s2949_s5 + $0x340] sm:$0xff] }
  0x31   : > { %v278_v59 = vld [vmem:[%s2949_s5 + $0x348] sm:$0xff]  ;;  %v321_v62 = vpack.c.bf16 %v214_v57, %v213_v56  ;;  %v217_v4 = vld [vmem:[%s2949_s5 + $0x160] sm:$0xff] }
  0x32   : > { %v353_v63 = vpack.c.bf16 %v278_v59, %v277_v58  ;;  %v218_v5 = vld [vmem:[%s2949_s5 + $0x168] sm:$0xff]  ;;  %v281_v6 = vld [vmem:[%s2949_s5 + $0x360] sm:$0xff] }
  0x33   : > { %v282_v7 = vld [vmem:[%s2949_s5 + $0x368] sm:$0xff]  ;;  %v323_v10 = vpack.c.bf16 %v218_v5, %v217_v4  ;;  %v221_v16 = vld [vmem:[%s2949_s5 + $0x180] sm:$0xff] }
  0x34   : > { %2644 = vmatmul.mubr.msk.bf16.gmra.mxu0 %vm388_vm0, %v308_v52  ;;  %2708 = vmatmul.mubr.msk.bf16.gmra.mxu1 %vm388_vm0, %v340_v53  ;;  %v211_v52 = vld [vmem:[%s2949_s5 + $0x130] sm:$0xff]  ;;  %v212_v53 = vld [vmem:[%s2949_s5 + $0x138] sm:$0xff]  ;;  %v355_v11 = vpack.c.bf16 %v282_v7, %v281_v6  ;;  %v222_v17 = vld [vmem:[%s2949_s5 + $0x188] sm:$0xff] }
  0x35   : > { %2647 = vmatprep.mubr.msk.bf16.mxu0 %vm388_vm0, %v309_v54  ;;  %2711 = vmatprep.mubr.msk.bf16.mxu1 %vm388_vm0, %v341_v55  ;;  %v275_v54 = vld [vmem:[%s2949_s5 + $0x330] sm:$0xff]  ;;  %v276_v55 = vld [vmem:[%s2949_s5 + $0x338] sm:$0xff]  ;;  %v320_v60 = vpack.c.bf16 %v212_v53, %v211_v52  ;;  %v285_v18 = vld [vmem:[%s2949_s5 + $0x380] sm:$0xff]  ;;  %v325_v22 = vpack.c.bf16 %v222_v17, %v221_v16 }
  0x36   : > { %v352_v61 = vpack.c.bf16 %v276_v55, %v275_v54  ;;  %v286_v19 = vld [vmem:[%s2949_s5 + $0x388] sm:$0xff]  ;;  %v225_v28 = vld [vmem:[%s2949_s5 + $0x1a0] sm:$0xff] }
  0x37   : > { %v357_v23 = vpack.c.bf16 %v286_v19, %v285_v18  ;;  %v226_v29 = vld [vmem:[%s2949_s5 + $0x1a8] sm:$0xff]  ;;  %v289_v30 = vld [vmem:[%s2949_s5 + $0x3a0] sm:$0xff] }
  0x38   : > { %v290_v31 = vld [vmem:[%s2949_s5 + $0x3a8] sm:$0xff]  ;;  %v327_v34 = vpack.c.bf16 %v226_v29, %v225_v28  ;;  %v229_v40 = vld [vmem:[%s2949_s5 + $0x1c0] sm:$0xff] }
  0x39   : > { %v359_v35 = vpack.c.bf16 %v290_v31, %v289_v30  ;;  %v230_v41 = vld [vmem:[%s2949_s5 + $0x1c8] sm:$0xff]  ;;  %v293_v42 = vld [vmem:[%s2949_s5 + $0x3c0] sm:$0xff] }
  0x3a   : > { %v294_v43 = vld [vmem:[%s2949_s5 + $0x3c8] sm:$0xff]  ;;  %v329_v46 = vpack.c.bf16 %v230_v41, %v229_v40  ;;  %v233_v52 = vld [vmem:[%s2949_s5 + $0x1e0] sm:$0xff] }
  0x3b   : > { %v361_v47 = vpack.c.bf16 %v294_v43, %v293_v42  ;;  %v234_v53 = vld [vmem:[%s2949_s5 + $0x1e8] sm:$0xff]  ;;  %v297_v54 = vld [vmem:[%s2949_s5 + $0x3e0] sm:$0xff] }
  0x3c   : > { %2648 = vmatmul.mubr.msk.bf16.gmra.mxu0 %vm388_vm0, %v310_v0  ;;  %2712 = vmatmul.mubr.msk.bf16.gmra.mxu1 %vm388_vm0, %v342_v1  ;;  %v215_v0 = vld [vmem:[%s2949_s5 + $0x150] sm:$0xff]  ;;  %v216_v1 = vld [vmem:[%s2949_s5 + $0x158] sm:$0xff]  ;;  %v298_v55 = vld [vmem:[%s2949_s5 + $0x3e8] sm:$0xff]  ;;  %v331_v58 = vpack.c.bf16 %v234_v53, %v233_v52 }
  0x3d   : > { %2651 = vmatprep.mubr.msk.bf16.mxu0 %vm388_vm0, %v311_v2  ;;  %2715 = vmatprep.mubr.msk.bf16.mxu1 %vm388_vm0, %v343_v3  ;;  %v279_v2 = vld [vmem:[%s2949_s5 + $0x350] sm:$0xff]  ;;  %v280_v3 = vld [vmem:[%s2949_s5 + $0x358] sm:$0xff]  ;;  %v322_v8 = vpack.c.bf16 %v216_v1, %v215_v0  ;;  %v363_v59 = vpack.c.bf16 %v298_v55, %v297_v54  ;;  %v3147_v4 = vld [vmem:[%s3398_s2] ss:$0 sm:$0xff] }
  0x3e   : > { %v354_v9 = vpack.c.bf16 %v280_v3, %v279_v2 }
  0x44   : > { %2652 = vmatmul.mubr.msk.bf16.gmra.mxu0 %vm388_vm0, %v312_v12  ;;  %2716 = vmatmul.mubr.msk.bf16.gmra.mxu1 %vm388_vm0, %v344_v13  ;;  %v219_v12 = vld [vmem:[%s2949_s5 + $0x170] sm:$0xff]  ;;  %v220_v13 = vld [vmem:[%s2949_s5 + $0x178] sm:$0xff] }
  0x45   : > { %2655 = vmatprep.mubr.msk.bf16.mxu0 %vm388_vm0, %v313_v14  ;;  %2719 = vmatprep.mubr.msk.bf16.mxu1 %vm388_vm0, %v345_v15  ;;  %v283_v14 = vld [vmem:[%s2949_s5 + $0x370] sm:$0xff]  ;;  %v284_v15 = vld [vmem:[%s2949_s5 + $0x378] sm:$0xff]  ;;  %v324_v20 = vpack.c.bf16 %v220_v13, %v219_v12 }
  0x46   : > { %v356_v21 = vpack.c.bf16 %v284_v15, %v283_v14 }
  0x4c   : > { %2656 = vmatmul.mubr.msk.bf16.gmra.mxu0 %vm388_vm0, %v314_v24  ;;  %2720 = vmatmul.mubr.msk.bf16.gmra.mxu1 %vm388_vm0, %v346_v25  ;;  %v223_v24 = vld [vmem:[%s2949_s5 + $0x190] sm:$0xff]  ;;  %v224_v25 = vld [vmem:[%s2949_s5 + $0x198] sm:$0xff] }
  0x4d   : > { %2659 = vmatprep.mubr.msk.bf16.mxu0 %vm388_vm0, %v315_v26  ;;  %2723 = vmatprep.mubr.msk.bf16.mxu1 %vm388_vm0, %v347_v27  ;;  %v287_v26 = vld [vmem:[%s2949_s5 + $0x390] sm:$0xff]  ;;  %v288_v27 = vld [vmem:[%s2949_s5 + $0x398] sm:$0xff]  ;;  %v326_v32 = vpack.c.bf16 %v224_v25, %v223_v24 }
  0x4e   : > { %v358_v33 = vpack.c.bf16 %v288_v27, %v287_v26 }
  0x54   : > { %2660 = vmatmul.mubr.msk.bf16.gmra.mxu0 %vm388_vm0, %v316_v36  ;;  %2724 = vmatmul.mubr.msk.bf16.gmra.mxu1 %vm388_vm0, %v348_v37  ;;  %v227_v36 = vld [vmem:[%s2949_s5 + $0x1b0] sm:$0xff]  ;;  %v228_v37 = vld [vmem:[%s2949_s5 + $0x1b8] sm:$0xff] }
  0x55   : > { %2663 = vmatprep.mubr.msk.bf16.mxu0 %vm388_vm0, %v317_v38  ;;  %2727 = vmatprep.mubr.msk.bf16.mxu1 %vm388_vm0, %v349_v39  ;;  %v291_v38 = vld [vmem:[%s2949_s5 + $0x3b0] sm:$0xff]  ;;  %v292_v39 = vld [vmem:[%s2949_s5 + $0x3b8] sm:$0xff]  ;;  %v328_v44 = vpack.c.bf16 %v228_v37, %v227_v36 }
  0x56   : > { %v360_v45 = vpack.c.bf16 %v292_v39, %v291_v38 }
  0x5c   : > { %2664 = vmatmul.mubr.msk.bf16.gmra.mxu0 %vm388_vm0, %v318_v48  ;;  %2728 = vmatmul.mubr.msk.bf16.gmra.mxu1 %vm388_vm0, %v350_v49  ;;  %v231_v48 = vld [vmem:[%s2949_s5 + $0x1d0] sm:$0xff]  ;;  %v232_v49 = vld [vmem:[%s2949_s5 + $0x1d8] sm:$0xff] }
  0x5d   : > { %2667 = vmatprep.mubr.msk.bf16.mxu0 %vm388_vm0, %v319_v50  ;;  %2731 = vmatprep.mubr.msk.bf16.mxu1 %vm388_vm0, %v351_v51  ;;  %v295_v50 = vld [vmem:[%s2949_s5 + $0x3d0] sm:$0xff]  ;;  %v296_v51 = vld [vmem:[%s2949_s5 + $0x3d8] sm:$0xff]  ;;  %v330_v56 = vpack.c.bf16 %v232_v49, %v231_v48 }
  0x5e   : > { %v362_v57 = vpack.c.bf16 %v296_v51, %v295_v50 }
  0x64   : > { %2668 = vmatmul.mubr.msk.bf16.gmra.mxu0 %vm388_vm0, %v320_v60  ;;  %2732 = vmatmul.mubr.msk.bf16.gmra.mxu1 %vm388_vm0, %v352_v61  ;;  %v235_v60 = vld [vmem:[%s2949_s5 + $0x1f0] sm:$0xff]  ;;  %v236_v61 = vld [vmem:[%s2949_s5 + $0x1f8] sm:$0xff] }
  0x65   : > { %2671 = vmatprep.mubr.msk.bf16.mxu0 %vm388_vm0, %v321_v62  ;;  %2735 = vmatprep.mubr.msk.bf16.mxu1 %vm388_vm0, %v353_v63  ;;  %v299_v62 = vld [vmem:[%s2949_s5 + $0x3f0] sm:$0xff]  ;;  %v300_v63 = vld [vmem:[%s2949_s5 + $0x3f8] sm:$0xff]  ;;  %v332_v0 = vpack.c.bf16 %v236_v61, %v235_v60 }
  0x66   : > { %v364_v1 = vpack.c.bf16 %v300_v63, %v299_v62 }
  0x6c   : > { %2672 = vmatmul.mubr.msk.bf16.gmra.mxu0 %vm388_vm0, %v322_v8  ;;  %2736 = vmatmul.mubr.msk.bf16.gmra.mxu1 %vm388_vm0, %v354_v9 }
  0x6d   : > { %2675 = vmatprep.mubr.msk.bf16.mxu0 %vm388_vm0, %v323_v10  ;;  %2739 = vmatprep.mubr.msk.bf16.mxu1 %vm388_vm0, %v355_v11 }
  0x74   : > { %2676 = vmatmul.mubr.msk.bf16.gmra.mxu0 %vm388_vm0, %v324_v20  ;;  %2740 = vmatmul.mubr.msk.bf16.gmra.mxu1 %vm388_vm0, %v356_v21 }
  0x75   : > { %2679 = vmatprep.mubr.msk.bf16.mxu0 %vm388_vm0, %v325_v22  ;;  %2743 = vmatprep.mubr.msk.bf16.mxu1 %vm388_vm0, %v357_v23 }
  0x7c   : > { %2680 = vmatmul.mubr.msk.bf16.gmra.mxu0 %vm388_vm0, %v326_v32  ;;  %2744 = vmatmul.mubr.msk.bf16.gmra.mxu1 %vm388_vm0, %v358_v33 }
  0x7d   : > { %2683 = vmatprep.mubr.msk.bf16.mxu0 %vm388_vm0, %v327_v34  ;;  %2747 = vmatprep.mubr.msk.bf16.mxu1 %vm388_vm0, %v359_v35 }
  0x84   : > { %2684 = vmatmul.mubr.msk.bf16.gmra.mxu0 %vm388_vm0, %v328_v44  ;;  %2748 = vmatmul.mubr.msk.bf16.gmra.mxu1 %vm388_vm0, %v360_v45 }
  0x85   : > { %2687 = vmatprep.mubr.msk.bf16.mxu0 %vm388_vm0, %v329_v46  ;;  %2751 = vmatprep.mubr.msk.bf16.mxu1 %vm388_vm0, %v361_v47 }
  0x8c   : > { %2688 = vmatmul.mubr.msk.bf16.gmra.mxu0 %vm388_vm0, %v330_v56  ;;  %2752 = vmatmul.mubr.msk.bf16.gmra.mxu1 %vm388_vm0, %v362_v57 }
  0x8d   : > { %2691 = vmatprep.mubr.msk.bf16.mxu0 %vm388_vm0, %v331_v58  ;;  %2755 = vmatprep.mubr.msk.bf16.mxu1 %vm388_vm0, %v363_v59 }
  0x94   : > { %2692 = vmatmul.mubr.msk.bf16.gmra.mxu0 %vm388_vm0, %v332_v0  ;;  %2756 = vmatmul.mubr.msk.bf16.gmra.mxu1 %vm388_vm0, %v364_v1 }
  0xdc   : > { %v2633_v2 = vpop.f32.mrf.mxu0  ;;  %v2697_v3 = vpop.f32.mrf.mxu1 }
  0xdd   : > { %v624_v8 = vadd.f32 %v2633_v2, %v3147_v4  ;;  %v880_v11 = vadd.f32 %v2697_v3, %v3147_v4 }
  0xde   : > { %v615_v5 = vpop.f32.mrf.mxu0  ;;  %v871_v6 = vpop.f32.mrf.mxu1 }
  0xdf   : > { %v616_v14 = vadd.f32 %v3147_v4, %v615_v5  ;;  %v872_v18 = vadd.f32 %v3147_v4, %v871_v6 }
  0xe0   : > { %v2634_v7 = vpop.f32.mrf.mxu0  ;;  %v2698_v10 = vpop.f32.mrf.mxu1 }
  0xe1   : > { %v627_v9 = vadd.f32 %v2634_v7, %v3147_v4  ;;  %v883_v12 = vadd.f32 %v2698_v10, %v3147_v4 }
  0xe2   : > { %v618_v13 = vpop.f32.mrf.mxu0  ;;  %v874_v17 = vpop.f32.mrf.mxu1 }
  0xe3   : > { %v2186_v15 = vpack.c.bf16 %v627_v9, %v624_v8  ;;  %v619_v16 = vadd.f32 %v3147_v4, %v618_v13  ;;  %v2346_v19 = vpack.c.bf16 %v883_v12, %v880_v11  ;;  %v875_v20 = vadd.f32 %v3147_v4, %v874_v17 }
  0xe4   : > { %v2637_v21 = vpop.f32.mrf.mxu0  ;;  %v2701_v23 = vpop.f32.mrf.mxu1 }
  0xe5   : > { %2498 = vst [vmem:[%s3159_s10 + $0x8] sm:$0xff] %v2186_v15   ;;  %v2181_v22 = vpack.c.bf16 %v619_v16, %v616_v14  ;;  %2530 = vst [vmem:[%s3159_s10 + $0x108] sm:$0xff] %v2346_v19   ;;  %v2341_v24 = vpack.c.bf16 %v875_v20, %v872_v18  ;;  %v640_v28 = vadd.f32 %v2637_v21, %v3147_v4 }
  0xe6   : > { %v631_v25 = vpop.f32.mrf.mxu0  ;;  %v887_v26 = vpop.f32.mrf.mxu1  ;;  %v896_v31 = vadd.f32 %v2701_v23, %v3147_v4 }
  0xe7   : > { %2182 = vst [vmem:[%s3159_s10] sm:$0xff] %v2181_v22   ;;  %2529 = vst [vmem:[%s3159_s10 + $0x100] sm:$0xff] %v2341_v24   ;;  %v632_v34 = vadd.f32 %v3147_v4, %v631_v25  ;;  %v888_v38 = vadd.f32 %v3147_v4, %v887_v26 }
  0xe8   : > { %v2638_v27 = vpop.f32.mrf.mxu0  ;;  %v2702_v30 = vpop.f32.mrf.mxu1 }
  0xe9   : > { %v643_v29 = vadd.f32 %v2638_v27, %v3147_v4  ;;  %v899_v32 = vadd.f32 %v2702_v30, %v3147_v4 }
  0xea   : > { %v634_v33 = vpop.f32.mrf.mxu0  ;;  %v890_v37 = vpop.f32.mrf.mxu1 }
  0xeb   : > { %v2196_v35 = vpack.c.bf16 %v643_v29, %v640_v28  ;;  %v635_v36 = vadd.f32 %v3147_v4, %v634_v33  ;;  %v2356_v39 = vpack.c.bf16 %v899_v32, %v896_v31  ;;  %v891_v40 = vadd.f32 %v3147_v4, %v890_v37 }
  0xec   : > { %v2641_v41 = vpop.f32.mrf.mxu0  ;;  %v2705_v43 = vpop.f32.mrf.mxu1 }
  0xed   : > { %2500 = vst [vmem:[%s3159_s10 + $0x18] sm:$0xff] %v2196_v35   ;;  %v2191_v42 = vpack.c.bf16 %v635_v36, %v632_v34  ;;  %2532 = vst [vmem:[%s3159_s10 + $0x118] sm:$0xff] %v2356_v39   ;;  %v2351_v44 = vpack.c.bf16 %v891_v40, %v888_v38  ;;  %v656_v48 = vadd.f32 %v2641_v41, %v3147_v4 }
  0xee   : > { %v647_v45 = vpop.f32.mrf.mxu0  ;;  %v903_v46 = vpop.f32.mrf.mxu1  ;;  %v912_v51 = vadd.f32 %v2705_v43, %v3147_v4 }
  0xef   : > { %2499 = vst [vmem:[%s3159_s10 + $0x10] sm:$0xff] %v2191_v42   ;;  %2531 = vst [vmem:[%s3159_s10 + $0x110] sm:$0xff] %v2351_v44   ;;  %v648_v54 = vadd.f32 %v3147_v4, %v647_v45  ;;  %v904_v58 = vadd.f32 %v3147_v4, %v903_v46 }
  0xf0   : > { %v2642_v47 = vpop.f32.mrf.mxu0  ;;  %v2706_v50 = vpop.f32.mrf.mxu1 }
  0xf1   : > { %v659_v49 = vadd.f32 %v2642_v47, %v3147_v4  ;;  %v915_v52 = vadd.f32 %v2706_v50, %v3147_v4 }
  0xf2   : > { %v650_v53 = vpop.f32.mrf.mxu0  ;;  %v906_v57 = vpop.f32.mrf.mxu1 }
  0xf3   : > { %v2206_v55 = vpack.c.bf16 %v659_v49, %v656_v48  ;;  %v651_v56 = vadd.f32 %v3147_v4, %v650_v53  ;;  %v2366_v59 = vpack.c.bf16 %v915_v52, %v912_v51  ;;  %v907_v60 = vadd.f32 %v3147_v4, %v906_v57 }
  0xf4   : > { %v2645_v61 = vpop.f32.mrf.mxu0  ;;  %v2709_v63 = vpop.f32.mrf.mxu1 }
  0xf5   : > { %2502 = vst [vmem:[%s3159_s10 + $0x28] sm:$0xff] %v2206_v55   ;;  %v2201_v62 = vpack.c.bf16 %v651_v56, %v648_v54  ;;  %2534 = vst [vmem:[%s3159_s10 + $0x128] sm:$0xff] %v2366_v59   ;;  %v2361_v0 = vpack.c.bf16 %v907_v60, %v904_v58  ;;  %v672_v5 = vadd.f32 %v2645_v61, %v3147_v4 }
  0xf6   : > { %v663_v1 = vpop.f32.mrf.mxu0  ;;  %v919_v2 = vpop.f32.mrf.mxu1  ;;  %v928_v8 = vadd.f32 %v2709_v63, %v3147_v4 }
  0xf7   : > { %2501 = vst [vmem:[%s3159_s10 + $0x20] sm:$0xff] %v2201_v62   ;;  %2533 = vst [vmem:[%s3159_s10 + $0x120] sm:$0xff] %v2361_v0   ;;  %v664_v11 = vadd.f32 %v3147_v4, %v663_v1  ;;  %v920_v15 = vadd.f32 %v3147_v4, %v919_v2 }
  0xf8   : > { %v2646_v3 = vpop.f32.mrf.mxu0  ;;  %v2710_v7 = vpop.f32.mrf.mxu1 }
  0xf9   : > { %v675_v6 = vadd.f32 %v2646_v3, %v3147_v4  ;;  %v931_v9 = vadd.f32 %v2710_v7, %v3147_v4 }
  0xfa   : > { %v666_v10 = vpop.f32.mrf.mxu0  ;;  %v922_v14 = vpop.f32.mrf.mxu1 }
  0xfb   : > { %v2216_v12 = vpack.c.bf16 %v675_v6, %v672_v5  ;;  %v667_v13 = vadd.f32 %v3147_v4, %v666_v10  ;;  %v2376_v16 = vpack.c.bf16 %v931_v9, %v928_v8  ;;  %v923_v17 = vadd.f32 %v3147_v4, %v922_v14 }
  0xfc   : > { %v2649_v18 = vpop.f32.mrf.mxu0  ;;  %v2713_v20 = vpop.f32.mrf.mxu1 }
  0xfd   : > { %2504 = vst [vmem:[%s3159_s10 + $0x38] sm:$0xff] %v2216_v12   ;;  %v2211_v19 = vpack.c.bf16 %v667_v13, %v664_v11  ;;  %2536 = vst [vmem:[%s3159_s10 + $0x138] sm:$0xff] %v2376_v16   ;;  %v2371_v21 = vpack.c.bf16 %v923_v17, %v920_v15  ;;  %v688_v25 = vadd.f32 %v2649_v18, %v3147_v4 }
  0xfe   : > { %v679_v22 = vpop.f32.mrf.mxu0  ;;  %v935_v23 = vpop.f32.mrf.mxu1  ;;  %v944_v28 = vadd.f32 %v2713_v20, %v3147_v4 }
  0xff   : > { %2503 = vst [vmem:[%s3159_s10 + $0x30] sm:$0xff] %v2211_v19   ;;  %2535 = vst [vmem:[%s3159_s10 + $0x130] sm:$0xff] %v2371_v21   ;;  %v680_v31 = vadd.f32 %v3147_v4, %v679_v22  ;;  %v936_v35 = vadd.f32 %v3147_v4, %v935_v23 }
 0x100   : > { %v2650_v24 = vpop.f32.mrf.mxu0  ;;  %v2714_v27 = vpop.f32.mrf.mxu1 }
 0x101   : > { %v691_v26 = vadd.f32 %v2650_v24, %v3147_v4  ;;  %v947_v29 = vadd.f32 %v2714_v27, %v3147_v4 }
 0x102   : > { %v682_v30 = vpop.f32.mrf.mxu0  ;;  %v938_v34 = vpop.f32.mrf.mxu1 }
 0x103   : > { %v2226_v32 = vpack.c.bf16 %v691_v26, %v688_v25  ;;  %v683_v33 = vadd.f32 %v3147_v4, %v682_v30  ;;  %v2386_v36 = vpack.c.bf16 %v947_v29, %v944_v28  ;;  %v939_v37 = vadd.f32 %v3147_v4, %v938_v34 }
 0x104   : > { %v2653_v38 = vpop.f32.mrf.mxu0  ;;  %v2717_v40 = vpop.f32.mrf.mxu1 }
 0x105   : > { %2506 = vst [vmem:[%s3159_s10 + $0x48] sm:$0xff] %v2226_v32   ;;  %v2221_v39 = vpack.c.bf16 %v683_v33, %v680_v31  ;;  %2538 = vst [vmem:[%s3159_s10 + $0x148] sm:$0xff] %v2386_v36   ;;  %v2381_v41 = vpack.c.bf16 %v939_v37, %v936_v35  ;;  %v704_v45 = vadd.f32 %v2653_v38, %v3147_v4 }
 0x106   : > { %v695_v42 = vpop.f32.mrf.mxu0  ;;  %v951_v43 = vpop.f32.mrf.mxu1  ;;  %v960_v48 = vadd.f32 %v2717_v40, %v3147_v4 }
 0x107   : > { %2505 = vst [vmem:[%s3159_s10 + $0x40] sm:$0xff] %v2221_v39   ;;  %2537 = vst [vmem:[%s3159_s10 + $0x140] sm:$0xff] %v2381_v41   ;;  %v696_v51 = vadd.f32 %v3147_v4, %v695_v42  ;;  %v952_v55 = vadd.f32 %v3147_v4, %v951_v43 }
 0x108   : > { %v2654_v44 = vpop.f32.mrf.mxu0  ;;  %v2718_v47 = vpop.f32.mrf.mxu1 }
 0x109   : > { %v707_v46 = vadd.f32 %v2654_v44, %v3147_v4  ;;  %v963_v49 = vadd.f32 %v2718_v47, %v3147_v4 }
 0x10a   : > { %v698_v50 = vpop.f32.mrf.mxu0  ;;  %v954_v54 = vpop.f32.mrf.mxu1 }
 0x10b   : > { %v2236_v52 = vpack.c.bf16 %v707_v46, %v704_v45  ;;  %v699_v53 = vadd.f32 %v3147_v4, %v698_v50  ;;  %v2396_v56 = vpack.c.bf16 %v963_v49, %v960_v48  ;;  %v955_v57 = vadd.f32 %v3147_v4, %v954_v54 }
 0x10c   : > { %v2657_v58 = vpop.f32.mrf.mxu0  ;;  %v2721_v60 = vpop.f32.mrf.mxu1 }
 0x10d   : > { %2508 = vst [vmem:[%s3159_s10 + $0x58] sm:$0xff] %v2236_v52   ;;  %v2231_v59 = vpack.c.bf16 %v699_v53, %v696_v51  ;;  %2540 = vst [vmem:[%s3159_s10 + $0x158] sm:$0xff] %v2396_v56   ;;  %v2391_v61 = vpack.c.bf16 %v955_v57, %v952_v55  ;;  %v720_v1 = vadd.f32 %v2657_v58, %v3147_v4 }
 0x10e   : > { %v711_v62 = vpop.f32.mrf.mxu0  ;;  %v967_v63 = vpop.f32.mrf.mxu1  ;;  %v976_v5 = vadd.f32 %v2721_v60, %v3147_v4 }
 0x10f   : > { %2507 = vst [vmem:[%s3159_s10 + $0x50] sm:$0xff] %v2231_v59   ;;  %2539 = vst [vmem:[%s3159_s10 + $0x150] sm:$0xff] %v2391_v61   ;;  %v712_v8 = vadd.f32 %v3147_v4, %v711_v62  ;;  %v968_v12 = vadd.f32 %v3147_v4, %v967_v63 }
 0x110   : > { %v2658_v0 = vpop.f32.mrf.mxu0  ;;  %v2722_v3 = vpop.f32.mrf.mxu1 }
 0x111   : > { %v723_v2 = vadd.f32 %v2658_v0, %v3147_v4  ;;  %v979_v6 = vadd.f32 %v2722_v3, %v3147_v4 }
 0x112   : > { %v714_v7 = vpop.f32.mrf.mxu0  ;;  %v970_v11 = vpop.f32.mrf.mxu1 }
 0x113   : > { %v2246_v9 = vpack.c.bf16 %v723_v2, %v720_v1  ;;  %v715_v10 = vadd.f32 %v3147_v4, %v714_v7  ;;  %v2406_v13 = vpack.c.bf16 %v979_v6, %v976_v5  ;;  %v971_v14 = vadd.f32 %v3147_v4, %v970_v11 }
 0x114   : > { %v2661_v15 = vpop.f32.mrf.mxu0  ;;  %v2725_v17 = vpop.f32.mrf.mxu1 }
 0x115   : > { %2510 = vst [vmem:[%s3159_s10 + $0x68] sm:$0xff] %v2246_v9   ;;  %v2241_v16 = vpack.c.bf16 %v715_v10, %v712_v8  ;;  %2542 = vst [vmem:[%s3159_s10 + $0x168] sm:$0xff] %v2406_v13   ;;  %v2401_v18 = vpack.c.bf16 %v971_v14, %v968_v12  ;;  %v736_v22 = vadd.f32 %v2661_v15, %v3147_v4 }
 0x116   : > { %v727_v19 = vpop.f32.mrf.mxu0  ;;  %v983_v20 = vpop.f32.mrf.mxu1  ;;  %v992_v25 = vadd.f32 %v2725_v17, %v3147_v4 }
 0x117   : > { %2509 = vst [vmem:[%s3159_s10 + $0x60] sm:$0xff] %v2241_v16   ;;  %2541 = vst [vmem:[%s3159_s10 + $0x160] sm:$0xff] %v2401_v18   ;;  %v728_v28 = vadd.f32 %v3147_v4, %v727_v19  ;;  %v984_v32 = vadd.f32 %v3147_v4, %v983_v20 }
 0x118   : > { %v2662_v21 = vpop.f32.mrf.mxu0  ;;  %v2726_v24 = vpop.f32.mrf.mxu1 }
 0x119   : > { %v739_v23 = vadd.f32 %v2662_v21, %v3147_v4  ;;  %v995_v26 = vadd.f32 %v2726_v24, %v3147_v4 }
 0x11a   : > { %v730_v27 = vpop.f32.mrf.mxu0  ;;  %v986_v31 = vpop.f32.mrf.mxu1 }
 0x11b   : > { %v2256_v29 = vpack.c.bf16 %v739_v23, %v736_v22  ;;  %v731_v30 = vadd.f32 %v3147_v4, %v730_v27  ;;  %v2416_v33 = vpack.c.bf16 %v995_v26, %v992_v25  ;;  %v987_v34 = vadd.f32 %v3147_v4, %v986_v31 }
 0x11c   : > { %v2665_v35 = vpop.f32.mrf.mxu0  ;;  %v2729_v37 = vpop.f32.mrf.mxu1 }
 0x11d   : > { %2512 = vst [vmem:[%s3159_s10 + $0x78] sm:$0xff] %v2256_v29   ;;  %v2251_v36 = vpack.c.bf16 %v731_v30, %v728_v28  ;;  %2544 = vst [vmem:[%s3159_s10 + $0x178] sm:$0xff] %v2416_v33   ;;  %v2411_v38 = vpack.c.bf16 %v987_v34, %v984_v32  ;;  %v752_v42 = vadd.f32 %v2665_v35, %v3147_v4 }
 0x11e   : > { %v743_v39 = vpop.f32.mrf.mxu0  ;;  %v999_v40 = vpop.f32.mrf.mxu1  ;;  %v1008_v45 = vadd.f32 %v2729_v37, %v3147_v4 }
 0x11f   : > { %2511 = vst [vmem:[%s3159_s10 + $0x70] sm:$0xff] %v2251_v36   ;;  %2543 = vst [vmem:[%s3159_s10 + $0x170] sm:$0xff] %v2411_v38   ;;  %v744_v48 = vadd.f32 %v3147_v4, %v743_v39  ;;  %v1000_v52 = vadd.f32 %v3147_v4, %v999_v40 }
 0x120   : > { %v2666_v41 = vpop.f32.mrf.mxu0  ;;  %v2730_v44 = vpop.f32.mrf.mxu1 }
 0x121   : > { %v755_v43 = vadd.f32 %v2666_v41, %v3147_v4  ;;  %v1011_v46 = vadd.f32 %v2730_v44, %v3147_v4 }
 0x122   : > { %v746_v47 = vpop.f32.mrf.mxu0  ;;  %v1002_v51 = vpop.f32.mrf.mxu1 }
 0x123   : > { %v2266_v49 = vpack.c.bf16 %v755_v43, %v752_v42  ;;  %v747_v50 = vadd.f32 %v3147_v4, %v746_v47  ;;  %v2426_v53 = vpack.c.bf16 %v1011_v46, %v1008_v45  ;;  %v1003_v54 = vadd.f32 %v3147_v4, %v1002_v51 }
 0x124   : > { %v2669_v55 = vpop.f32.mrf.mxu0  ;;  %v2733_v57 = vpop.f32.mrf.mxu1 }
 0x125   : > { %2514 = vst [vmem:[%s3159_s10 + $0x88] sm:$0xff] %v2266_v49   ;;  %v2261_v56 = vpack.c.bf16 %v747_v50, %v744_v48  ;;  %2546 = vst [vmem:[%s3159_s10 + $0x188] sm:$0xff] %v2426_v53   ;;  %v2421_v58 = vpack.c.bf16 %v1003_v54, %v1000_v52  ;;  %v768_v62 = vadd.f32 %v2669_v55, %v3147_v4 }
 0x126   : > { %v759_v59 = vpop.f32.mrf.mxu0  ;;  %v1015_v60 = vpop.f32.mrf.mxu1  ;;  %v1024_v1 = vadd.f32 %v2733_v57, %v3147_v4 }
 0x127   : > { %2513 = vst [vmem:[%s3159_s10 + $0x80] sm:$0xff] %v2261_v56   ;;  %2545 = vst [vmem:[%s3159_s10 + $0x180] sm:$0xff] %v2421_v58   ;;  %v760_v5 = vadd.f32 %v3147_v4, %v759_v59  ;;  %v1016_v9 = vadd.f32 %v3147_v4, %v1015_v60 }
 0x128   : > { %v2670_v61 = vpop.f32.mrf.mxu0  ;;  %v2734_v0 = vpop.f32.mrf.mxu1 }
 0x129   : > { %v771_v63 = vadd.f32 %v2670_v61, %v3147_v4  ;;  %v1027_v2 = vadd.f32 %v2734_v0, %v3147_v4 }
 0x12a   : > { %v762_v3 = vpop.f32.mrf.mxu0  ;;  %v1018_v8 = vpop.f32.mrf.mxu1 }
 0x12b   : > { %v2276_v6 = vpack.c.bf16 %v771_v63, %v768_v62  ;;  %v763_v7 = vadd.f32 %v3147_v4, %v762_v3  ;;  %v2436_v10 = vpack.c.bf16 %v1027_v2, %v1024_v1  ;;  %v1019_v11 = vadd.f32 %v3147_v4, %v1018_v8 }
 0x12c   : > { %v2673_v12 = vpop.f32.mrf.mxu0  ;;  %v2737_v14 = vpop.f32.mrf.mxu1 }
 0x12d   : > { %2516 = vst [vmem:[%s3159_s10 + $0x98] sm:$0xff] %v2276_v6   ;;  %v2271_v13 = vpack.c.bf16 %v763_v7, %v760_v5  ;;  %2548 = vst [vmem:[%s3159_s10 + $0x198] sm:$0xff] %v2436_v10   ;;  %v2431_v15 = vpack.c.bf16 %v1019_v11, %v1016_v9  ;;  %v784_v19 = vadd.f32 %v2673_v12, %v3147_v4 }
 0x12e   : > { %v775_v16 = vpop.f32.mrf.mxu0  ;;  %v1031_v17 = vpop.f32.mrf.mxu1  ;;  %v1040_v22 = vadd.f32 %v2737_v14, %v3147_v4 }
 0x12f   : > { %2515 = vst [vmem:[%s3159_s10 + $0x90] sm:$0xff] %v2271_v13   ;;  %2547 = vst [vmem:[%s3159_s10 + $0x190] sm:$0xff] %v2431_v15   ;;  %v776_v25 = vadd.f32 %v3147_v4, %v775_v16  ;;  %v1032_v29 = vadd.f32 %v3147_v4, %v1031_v17 }
 0x130   : > { %v2674_v18 = vpop.f32.mrf.mxu0  ;;  %v2738_v21 = vpop.f32.mrf.mxu1 }
 0x131   : > { %v787_v20 = vadd.f32 %v2674_v18, %v3147_v4  ;;  %v1043_v23 = vadd.f32 %v2738_v21, %v3147_v4 }
 0x132   : > { %v778_v24 = vpop.f32.mrf.mxu0  ;;  %v1034_v28 = vpop.f32.mrf.mxu1 }
 0x133   : > { %v2286_v26 = vpack.c.bf16 %v787_v20, %v784_v19  ;;  %v779_v27 = vadd.f32 %v3147_v4, %v778_v24  ;;  %v2446_v30 = vpack.c.bf16 %v1043_v23, %v1040_v22  ;;  %v1035_v31 = vadd.f32 %v3147_v4, %v1034_v28 }
 0x134   : > { %v2677_v32 = vpop.f32.mrf.mxu0  ;;  %v2741_v34 = vpop.f32.mrf.mxu1 }
 0x135   : > { %2518 = vst [vmem:[%s3159_s10 + $0xa8] sm:$0xff] %v2286_v26   ;;  %v2281_v33 = vpack.c.bf16 %v779_v27, %v776_v25  ;;  %2550 = vst [vmem:[%s3159_s10 + $0x1a8] sm:$0xff] %v2446_v30   ;;  %v2441_v35 = vpack.c.bf16 %v1035_v31, %v1032_v29  ;;  %v800_v39 = vadd.f32 %v2677_v32, %v3147_v4 }
 0x136   : > { %v791_v36 = vpop.f32.mrf.mxu0  ;;  %v1047_v37 = vpop.f32.mrf.mxu1  ;;  %v1056_v42 = vadd.f32 %v2741_v34, %v3147_v4 }
 0x137   : > { %2517 = vst [vmem:[%s3159_s10 + $0xa0] sm:$0xff] %v2281_v33   ;;  %2549 = vst [vmem:[%s3159_s10 + $0x1a0] sm:$0xff] %v2441_v35   ;;  %v792_v45 = vadd.f32 %v3147_v4, %v791_v36  ;;  %v1048_v49 = vadd.f32 %v3147_v4, %v1047_v37 }
 0x138   : > { %v2678_v38 = vpop.f32.mrf.mxu0  ;;  %v2742_v41 = vpop.f32.mrf.mxu1 }
 0x139   : > { %v803_v40 = vadd.f32 %v2678_v38, %v3147_v4  ;;  %v1059_v43 = vadd.f32 %v2742_v41, %v3147_v4 }
 0x13a   : > { %v794_v44 = vpop.f32.mrf.mxu0  ;;  %v1050_v48 = vpop.f32.mrf.mxu1 }
 0x13b   : > { %v2296_v46 = vpack.c.bf16 %v803_v40, %v800_v39  ;;  %v795_v47 = vadd.f32 %v3147_v4, %v794_v44  ;;  %v2456_v50 = vpack.c.bf16 %v1059_v43, %v1056_v42  ;;  %v1051_v51 = vadd.f32 %v3147_v4, %v1050_v48 }
 0x13c   : > { %v2681_v52 = vpop.f32.mrf.mxu0  ;;  %v2745_v54 = vpop.f32.mrf.mxu1 }
 0x13d   : > { %2520 = vst [vmem:[%s3159_s10 + $0xb8] sm:$0xff] %v2296_v46   ;;  %v2291_v53 = vpack.c.bf16 %v795_v47, %v792_v45  ;;  %2552 = vst [vmem:[%s3159_s10 + $0x1b8] sm:$0xff] %v2456_v50   ;;  %v2451_v55 = vpack.c.bf16 %v1051_v51, %v1048_v49  ;;  %v816_v59 = vadd.f32 %v2681_v52, %v3147_v4 }
 0x13e   : > { %v807_v56 = vpop.f32.mrf.mxu0  ;;  %v1063_v57 = vpop.f32.mrf.mxu1  ;;  %v1072_v62 = vadd.f32 %v2745_v54, %v3147_v4 }
 0x13f   : > { %2519 = vst [vmem:[%s3159_s10 + $0xb0] sm:$0xff] %v2291_v53   ;;  %2551 = vst [vmem:[%s3159_s10 + $0x1b0] sm:$0xff] %v2451_v55   ;;  %v808_v1 = vadd.f32 %v3147_v4, %v807_v56  ;;  %v1064_v6 = vadd.f32 %v3147_v4, %v1063_v57 }
 0x140   : > { %v2682_v58 = vpop.f32.mrf.mxu0  ;;  %v2746_v61 = vpop.f32.mrf.mxu1 }
 0x141   : > { %v819_v60 = vadd.f32 %v2682_v58, %v3147_v4  ;;  %v1075_v63 = vadd.f32 %v2746_v61, %v3147_v4 }
 0x142   : > { %v810_v0 = vpop.f32.mrf.mxu0  ;;  %v1066_v5 = vpop.f32.mrf.mxu1 }
 0x143   : > { %v2306_v2 = vpack.c.bf16 %v819_v60, %v816_v59  ;;  %v811_v3 = vadd.f32 %v3147_v4, %v810_v0  ;;  %v2466_v7 = vpack.c.bf16 %v1075_v63, %v1072_v62  ;;  %v1067_v8 = vadd.f32 %v3147_v4, %v1066_v5 }
 0x144   : > { %v2685_v9 = vpop.f32.mrf.mxu0  ;;  %v2749_v11 = vpop.f32.mrf.mxu1 }
 0x145   : > { %2522 = vst [vmem:[%s3159_s10 + $0xc8] sm:$0xff] %v2306_v2   ;;  %v2301_v10 = vpack.c.bf16 %v811_v3, %v808_v1  ;;  %2554 = vst [vmem:[%s3159_s10 + $0x1c8] sm:$0xff] %v2466_v7   ;;  %v2461_v12 = vpack.c.bf16 %v1067_v8, %v1064_v6  ;;  %v832_v16 = vadd.f32 %v2685_v9, %v3147_v4 }
 0x146   : > { %v823_v13 = vpop.f32.mrf.mxu0  ;;  %v1079_v14 = vpop.f32.mrf.mxu1  ;;  %v1088_v19 = vadd.f32 %v2749_v11, %v3147_v4 }
 0x147   : > { %2521 = vst [vmem:[%s3159_s10 + $0xc0] sm:$0xff] %v2301_v10   ;;  %2553 = vst [vmem:[%s3159_s10 + $0x1c0] sm:$0xff] %v2461_v12   ;;  %v824_v22 = vadd.f32 %v3147_v4, %v823_v13  ;;  %v1080_v26 = vadd.f32 %v3147_v4, %v1079_v14 }
 0x148   : > { %v2686_v15 = vpop.f32.mrf.mxu0  ;;  %v2750_v18 = vpop.f32.mrf.mxu1 }
 0x149   : > { %v835_v17 = vadd.f32 %v2686_v15, %v3147_v4  ;;  %v1091_v20 = vadd.f32 %v2750_v18, %v3147_v4 }
 0x14a   : > { %v826_v21 = vpop.f32.mrf.mxu0  ;;  %v1082_v25 = vpop.f32.mrf.mxu1 }
 0x14b   : > { %v2316_v23 = vpack.c.bf16 %v835_v17, %v832_v16  ;;  %v827_v24 = vadd.f32 %v3147_v4, %v826_v21  ;;  %v2476_v27 = vpack.c.bf16 %v1091_v20, %v1088_v19  ;;  %v1083_v28 = vadd.f32 %v3147_v4, %v1082_v25 }
 0x14c   : > { %v2689_v29 = vpop.f32.mrf.mxu0  ;;  %v2753_v31 = vpop.f32.mrf.mxu1 }
 0x14d   : > { %2524 = vst [vmem:[%s3159_s10 + $0xd8] sm:$0xff] %v2316_v23   ;;  %v2311_v30 = vpack.c.bf16 %v827_v24, %v824_v22  ;;  %2556 = vst [vmem:[%s3159_s10 + $0x1d8] sm:$0xff] %v2476_v27   ;;  %v2471_v32 = vpack.c.bf16 %v1083_v28, %v1080_v26  ;;  %v848_v36 = vadd.f32 %v2689_v29, %v3147_v4 }
 0x14e   : > { %v839_v33 = vpop.f32.mrf.mxu0  ;;  %v1095_v34 = vpop.f32.mrf.mxu1  ;;  %v1104_v39 = vadd.f32 %v2753_v31, %v3147_v4 }
 0x14f   : > { %2523 = vst [vmem:[%s3159_s10 + $0xd0] sm:$0xff] %v2311_v30   ;;  %2555 = vst [vmem:[%s3159_s10 + $0x1d0] sm:$0xff] %v2471_v32   ;;  %v840_v42 = vadd.f32 %v3147_v4, %v839_v33  ;;  %v1096_v46 = vadd.f32 %v3147_v4, %v1095_v34 }
 0x150   : > { %v2690_v35 = vpop.f32.mrf.mxu0  ;;  %v2754_v38 = vpop.f32.mrf.mxu1 }
 0x151   : > { %v851_v37 = vadd.f32 %v2690_v35, %v3147_v4  ;;  %v1107_v40 = vadd.f32 %v2754_v38, %v3147_v4 }
 0x152   : > { %v842_v41 = vpop.f32.mrf.mxu0  ;;  %v1098_v45 = vpop.f32.mrf.mxu1 }
 0x153   : > { %v2326_v43 = vpack.c.bf16 %v851_v37, %v848_v36  ;;  %v843_v44 = vadd.f32 %v3147_v4, %v842_v41  ;;  %v2486_v47 = vpack.c.bf16 %v1107_v40, %v1104_v39  ;;  %v1099_v48 = vadd.f32 %v3147_v4, %v1098_v45 }
 0x154   : > { %v2693_v49 = vpop.f32.mrf.mxu0  ;;  %v2757_v51 = vpop.f32.mrf.mxu1 }
 0x155   : > { %2526 = vst [vmem:[%s3159_s10 + $0xe8] sm:$0xff] %v2326_v43   ;;  %v2321_v50 = vpack.c.bf16 %v843_v44, %v840_v42  ;;  %2558 = vst [vmem:[%s3159_s10 + $0x1e8] sm:$0xff] %v2486_v47   ;;  %v2481_v52 = vpack.c.bf16 %v1099_v48, %v1096_v46  ;;  %v864_v56 = vadd.f32 %v2693_v49, %v3147_v4 }
 0x156   : > { %v855_v53 = vpop.f32.mrf.mxu0  ;;  %v1111_v54 = vpop.f32.mrf.mxu1  ;;  %v1120_v59 = vadd.f32 %v2757_v51, %v3147_v4 }
 0x157   : > { %2525 = vst [vmem:[%s3159_s10 + $0xe0] sm:$0xff] %v2321_v50   ;;  %2557 = vst [vmem:[%s3159_s10 + $0x1e0] sm:$0xff] %v2481_v52   ;;  %v856_v62 = vadd.f32 %v3147_v4, %v855_v53  ;;  %v1112_v2 = vadd.f32 %v3147_v4, %v1111_v54 }
 0x158   : > { %v2694_v55 = vpop.f32.mrf.mxu0  ;;  %v2758_v58 = vpop.f32.mrf.mxu1 }
 0x159   : > { %v867_v57 = vadd.f32 %v2694_v55, %v3147_v4  ;;  %v1123_v60 = vadd.f32 %v2758_v58, %v3147_v4 }
 0x15a   : > { %v858_v61 = vpop.f32.mrf.mxu0  ;;  %v1114_v1 = vpop.f32.mrf.mxu1 }
 0x15b   : > { %v2336_v63 = vpack.c.bf16 %v867_v57, %v864_v56  ;;  %v859_v0 = vadd.f32 %v3147_v4, %v858_v61  ;;  %v2496_v3 = vpack.c.bf16 %v1123_v60, %v1120_v59  ;;  %v1115_v5 = vadd.f32 %v3147_v4, %v1114_v1 }
 0x15d   : > { %2528 = vst [vmem:[%s3159_s10 + $0xf8] sm:$0xff] %v2336_v63   ;;  %v2331_v6 = vpack.c.bf16 %v859_v0, %v856_v62  ;;  %2560 = vst [vmem:[%s3159_s10 + $0x1f8] sm:$0xff] %v2496_v3   ;;  %v2491_v7 = vpack.c.bf16 %v1115_v5, %v1112_v2 }
 0x15f   : > { %2527 = vst [vmem:[%s3159_s10 + $0xf0] sm:$0xff] %v2331_v6   ;;  %2559 = vst [vmem:[%s3159_s10 + $0x1f0] sm:$0xff] %v2491_v7  }
 0x160   : > { %2819 = shalt.err (!%p2816_p3)
}
 0x161   : > { %s2820_s29 = scalar_lea.hbm %s3347_s16, 8192  ;;  %s2824_s5 = scalar_lea.hbm %s3399_s3, 16384 }
 0x162   : > { %p2821_p4 = scmp.ne.s32.totalorder %s3347_s16, %s2820_s29  ;;  %p2825_p9 = scmp.lt.s32.totalorder %s3347_s16, %s3399_s3 }
 0x163   : > { %p2826_p10 = scmp.lt.s32.totalorder %s2824_s5, %s2820_s29 }
 0x164   : > { %p2822_p7 = pnand %p2821_p4, %p2929_p5 }
 0x165   : > { %p2827_p11 = por %p2826_p10, %p2825_p9 }
 0x166   : > { %p2823_p8 = pneg %p2822_p7 }
 0x168   : > { %p2828_p12 = pnand %p2827_p11, %p2823_p8 }
 0x16a   : > { %2831 = shalt.err (!%p2828_p12)
}
 0x16b   : > { %s2869_s8 = smov 64   ;;  %s2870_s9 = smov 4  }
 0x16c   : > { %2763 = dma.vmem_to_hbm [thread:$0]  (%p2929_p5), %s3349_s17, 8192, %s3347_s16, %s3356_s24, %s2869_s8, %s2869_s8, %s2870_s9  }
 0x16d PF: > { %p2769_p13 = scmp.ge.s32.totalorder %s2866_s15, 2  ;;  %s1795_s10 = sand.u32 1, %s2854_s12  }
 0x16e   : > { %s1796_s11 = scalar_lea.sflag [#allocation3], %s1795_s10 }
 0x16f   : > { %p2766_p0 = pnand %p2769_p13, %p2933_p6 }
 0x171   : > { %p2767_p1 = pneg %p2766_p0 }
 0x173   : > { %2849 = dma.done.wait (%p2767_p1), %s1796_s11, 8192  }
 0x174   : > { %2851 = vsyncadd (%p2767_p1), %s1796_s11, 4294959104  ;;  %p13_p2 = scmp.ge.s32.totalorder %s2916_s18, 4   ;;  %s3402_s12 = smov %s2858_s13 }
 0x175   : > { %s3403_s13 = smov %s2862_s14  ;;  %s3404_s14 = smov %s2927_s21 }
 0x176   : > { %s3405_s15 = smov %s2916_s18  ;;  %15 = sbr.rel (!%p13_p2) target bundleno = 3 (0x3), region = 67 }
 0x17b   :  { %1801 = vsyncpa [#allocation3], 1 }
 0x17c   :  { %1803 = vsyncpa [#allocation3 + $0x1], 1 }

</bundles_post_ra>
